<compile_context>
chip_gen: v7x
topology: tpu7x:2x2x1
jax: 0.10.0
libtpu: 0.0.40
codegen_flags: <defaults>
</compile_context>

<pallas_src>
import jax
import jax.numpy as jnp
from jax import lax
from jax.experimental import pallas as pl
from jax.experimental.pallas import tpu as pltpu


_INV_SQRT2 = 0.7071067811865476


# ----------------------------- kernel helpers ------------------------------

def _layernorm(x, w, b, eps=1e-5):
    mu = jnp.mean(x, axis=-1, keepdims=True)
    var = jnp.mean((x - mu) ** 2, axis=-1, keepdims=True)
    return (x - mu) * lax.rsqrt(var + eps) * w + b


def _gelu_exact(x):
    # nn.GELU() default: exact erf-based GELU.
    return 0.5 * x * (1.0 + lax.erf(x * _INV_SQRT2))


# ------------------------------- the kernel --------------------------------

def encoder_layer_kernel(h_ref, pos_ref, mask_ref, k_ref, v_ref,
                         wq_ref, wo_ref, w1_ref, w2_ref, vecs_ref, b1_ref,
                         out_ref,
                         qh_sc, ctx_sc):
    # grid = (batch, query_tile); one step == one query-row tile of one batch.
    H, D, S = k_ref.shape            # per-batch K block: (heads, head_dim, seq)

    # Packed bias / LayerNorm vectors (f32):
    #   rows = [bq*scale, bo, ln1w, ln1b, ln2w, ln2b, b2]
    vecs = vecs_ref[...]
    bq, bo = vecs[0:1], vecs[1:2]
    ln1w, ln1b = vecs[2:3], vecs[3:4]
    ln2w, ln2b = vecs[4:5], vecs[5:6]
    b2 = vecs[6:7]

    h_tile = h_ref[...]                                         # (TQ, E) f32
    hp = (h_tile + pos_ref[...]).astype(jnp.bfloat16)           # queries get pos emb

    # Q projection at full contraction depth E (scaling folded into wq / bq).
    q = jnp.dot(hp, wq_ref[...], preferred_element_type=jnp.float32) + bq
    q = q.astype(jnp.bfloat16)

    # Head split once per tile: lane-slice each head into the (H, TQ, D)
    # scratch (robust lowering; relayout amortised over the whole tile).
    for hd in range(H):
        qh_sc[hd] = q[:, hd * D:(hd + 1) * D]
    qh = qh_sc[...]                                             # (H, TQ, D) bf16

    # Heads-batched attention: one dot_general for QK^T, one for PV.
    scores = jnp.einsum("hqd,hds->hqs", qh, k_ref[...],
                        preferred_element_type=jnp.float32)     # (H, TQ, S)
    scores = scores + mask_ref[...].astype(jnp.float32)[None]   # broadcast over heads
    scores = scores - jnp.max(scores, axis=-1, keepdims=True)
    p = jnp.exp(scores)
    p = p * pl.reciprocal(jnp.sum(p, axis=-1, keepdims=True), approx=True)
    ctx = jnp.einsum("hqs,hsd->hqd", p.astype(jnp.bfloat16), v_ref[...],
                     preferred_element_type=jnp.float32)        # (H, TQ, D)

    # Fold heads back into a lane-dense (TQ, E) buffer, then ONE out-projection
    # matmul at full contraction depth E.
    for hd in range(H):
        ctx_sc[:, hd * D:(hd + 1) * D] = ctx[hd].astype(jnp.bfloat16)
    attn = jnp.dot(ctx_sc[...], wo_ref[...],
                   preferred_element_type=jnp.float32) + bo     # (TQ, E) f32

    # residual + LayerNorm (f32)
    h1 = _layernorm(h_tile + attn, ln1w, ln1b)

    # feed-forward (bf16 matmul operands, f32 accumulation / activation)
    f = jnp.dot(h1.astype(jnp.bfloat16), w1_ref[...],
                preferred_element_type=jnp.float32) + b1_ref[...]
    f = _gelu_exact(f)
    f = jnp.dot(f.astype(jnp.bfloat16), w2_ref[...],
                preferred_element_type=jnp.float32) + b2

    out_ref[...] = _layernorm(h1 + f, ln2w, ln2b)


# -------------------------------- wrapper ----------------------------------

def detr_encoder_layer(hidden_states, attention_mask, position_embeddings,
                       params, num_heads, *, q_tile=256,
                       single_buffer_params=True):
    B, S, E = hidden_states.shape
    I = params["w1"].shape[0]
    assert E % num_heads == 0
    H = num_heads
    D = E // H
    scaling = D ** -0.5
    cdt = jnp.bfloat16

    # ---- K / V projection hoisted out of the kernel (tiny XLA matmuls).
    #      Passed in head-major layout so the kernel never splits heads of K/V.
    hp_full = (hidden_states + position_embeddings).astype(cdt)
    k = jnp.einsum("bse,oe->bso", hp_full, params["wk"].astype(cdt),
                   preferred_element_type=jnp.float32) + params["bk"][0]
    v = jnp.einsum("bse,oe->bso", hidden_states.astype(cdt),
                   params["wv"].astype(cdt),
                   preferred_element_type=jnp.float32) + params["bv"][0]
    k = k.reshape(B, S, H, D).transpose(0, 2, 3, 1).astype(cdt)   # (B,H,D,S)
    v = v.reshape(B, S, H, D).transpose(0, 2, 1, 3).astype(cdt)   # (B,H,S,D)

    # ---- query tiling; pad the query dim so S need not divide the tile ----
    if S <= q_tile:
        tq, s_pad = S, S
    else:
        assert q_tile % 8 == 0, "q_tile must be a multiple of 8"
        tq = q_tile
        s_pad = int(pl.cdiv(S, tq)) * tq
    n_qt = s_pad // tq

    h_in, pos_in, mask_in = hidden_states, position_embeddings, attention_mask
    if s_pad != S:
        pad = s_pad - S
        h_in = jnp.pad(h_in, ((0, 0), (0, pad), (0, 0)))
        pos_in = jnp.pad(pos_in, ((0, 0), (0, pad), (0, 0)))
        mask_in = jnp.pad(mask_in, ((0, 0), (0, 0), (0, pad), (0, 0)))
    mask_in = mask_in.astype(cdt)     # bf16 mask: halves the largest per-step DMA

    # ---- pre-transposed bf16 (in, out) weights; q-scaling folded into wq/bq ----
    wq_t = (params["wq"] * scaling).T.astype(cdt)                 # (E, E)
    wo_t = params["wo"].T.astype(cdt)                             # (E, E)
    w1_t = params["w1"].T.astype(cdt)                             # (E, I)
    w2_t = params["w2"].T.astype(cdt)                             # (I, E)
    vecs = jnp.concatenate([
        params["bq"] * scaling, params["bo"],
        params["ln1w"], params["ln1b"],
        params["ln2w"], params["ln2b"],
        params["b2"],
    ], axis=0).astype(jnp.float32)                                # (7, E)
    b1 = params["b1"].astype(jnp.float32)                         # (1, I)

    def build(param_mode):
        def const(shape):
            idx = lambda b, t: (0,) * len(shape)
            if param_mode is None:
                return pl.BlockSpec(shape, idx)
            # Single-buffer the constant parameter blocks (fetched once).
            return pl.BlockSpec(shape, idx, pipeline_mode=param_mode)

        in_specs = [
            pl.BlockSpec((None, tq, E), lambda b, t: (b, t, 0)),          # hidden tile
            pl.BlockSpec((None, tq, E), lambda b, t: (b, t, 0)),          # pos tile
            pl.BlockSpec((None, None, tq, S), lambda b, t: (b, 0, t, 0)), # mask (bf16)
            pl.BlockSpec((None, H, D, S), lambda b, t: (b, 0, 0, 0)),     # K per batch
            pl.BlockSpec((None, H, S, D), lambda b, t: (b, 0, 0, 0)),     # V per batch
            const((E, E)),    # wq (scaled)
            const((E, E)),    # wo
            const((E, I)),    # fc1 weight
            const((I, E)),    # fc2 weight
            const((7, E)),    # packed biases + LayerNorm params
            const((1, I)),    # fc1 bias
        ]
        out_spec = pl.BlockSpec((None, tq, E), lambda b, t: (b, t, 0))
        return pl.pallas_call(
            encoder_layer_kernel,
            out_shape=jax.ShapeDtypeStruct((B, s_pad, E), jnp.float32),
            grid=(B, n_qt),
            in_specs=in_specs,
            out_specs=out_spec,
            scratch_shapes=[pltpu.VMEM((H, tq, D), cdt),   # q head split
                            pltpu.VMEM((tq, E), cdt)],     # folded head contexts
            compiler_params=pltpu.CompilerParams(
                # Both axes independent now that K/V are hoisted -> megacore /
                # 2-TC v7x can split over query tiles even at batch=1.
                dimension_semantics=("parallel", "parallel"),
                # Right-sized: fits comfortably under v7x's 64 MiB physical VMEM.
                vmem_limit_bytes=32 * 1024 * 1024,
            ),
        )

    args = (h_in, pos_in, mask_in, k, v, wq_t, wo_t, w1_t, w2_t, vecs, b1)
    if single_buffer_params:
        try:
            out = build(pl.Buffered(1))(*args)
        except Exception:
            # pipeline_mode=Buffered(1) not supported by this jax build:
            # fall back to default (double-buffered) constant blocks.
            out = build(None)(*args)
    else:
        out = build(None)(*args)

    return out[:, :S, :] if s_pad != S else out


# ----------------------------- pure-JAX reference ---------------------------

def reference(hidden_states, attention_mask, position_embeddings, params,
              num_heads):
    B, S, E = hidden_states.shape
    D = E // num_heads
    scaling = D ** -0.5
    h = hidden_states
    hp = h + position_embeddings

    def lin(x, w, b):
        return jnp.einsum("bse,oe->bso", x, w) + b

    q = lin(hp, params["wq"], params["bq"][0]) * scaling
    k = lin(hp, params["wk"], params["bk"][0])
    v = lin(h, params["wv"], params["bv"][0])

    def split(x):  # (B,S,E) -> (B,H,S,D)
        return x.reshape(B, S, num_heads, D).transpose(0, 2, 1, 3)

    qh, kh, vh = split(q), split(k), split(v)
    scores = jnp.einsum("bhtd,bhsd->bhts", qh, kh) + attention_mask
    p = jax.nn.softmax(scores, axis=-1)
    o = jnp.einsum("bhts,bhsd->bhtd", p, vh).transpose(0, 2, 1, 3).reshape(B, S, E)
    o = jnp.einsum("bse,oe->bso", o, params["wo"]) + params["bo"][0]

    def ln(x, w, b):
        mu = x.mean(-1, keepdims=True)
        var = ((x - mu) ** 2).mean(-1, keepdims=True)
        return (x - mu) * lax.rsqrt(var + 1e-5) * w[0] + b[0]

    h1 = ln(h + o, params["ln1w"], params["ln1b"])
    f = jnp.einsum("bse,ie->bsi", h1, params["w1"]) + params["b1"][0]
    f = 0.5 * f * (1.0 + lax.erf(f * _INV_SQRT2))
    f = jnp.einsum("bsi,ei->bse", f, params["w2"]) + params["b2"][0]
    return ln(h1 + f, params["ln2w"], params["ln2b"])


# --------------------------------- main -------------------------------------

if __name__ == "__main__":
    # Small DETR-encoder-like config.
    B, E, H, I = 2, 32, 4, 64   # batch, hidden, heads, intermediate

    key = jax.random.PRNGKey(0)
    keys = jax.random.split(key, 24)

    def init(k, shape, scale=0.05):
        return (scale * jax.random.normal(k, shape)).astype(jnp.float32)

    params = {
        "wq": init(keys[0], (E, E)), "bq": init(keys[1], (1, E)),
        "wk": init(keys[2], (E, E)), "bk": init(keys[3], (1, E)),
        "wv": init(keys[4], (E, E)), "bv": init(keys[5], (1, E)),
        "wo": init(keys[6], (E, E)), "bo": init(keys[7], (1, E)),
        "ln1w": jnp.ones((1, E), jnp.float32),
        "ln1b": jnp.zeros((1, E), jnp.float32),
        "w1": init(keys[8], (I, E)), "b1": init(keys[9], (1, I)),
        "w2": init(keys[10], (E, I)), "b2": init(keys[11], (1, E)),
        "ln2w": jnp.ones((1, E), jnp.float32),
        "ln2b": jnp.zeros((1, E), jnp.float32),
    }

    def run_case(k_h, k_p, S, q_tile):
        hidden = jax.random.normal(k_h, (B, S, E), jnp.float32)
        pos = jax.random.normal(k_p, (B, S, E), jnp.float32)
        # Additive mask: last 2 source positions of batch 1 are masked out.
        mask = jnp.zeros((B, 1, S, S), jnp.float32)
        mask = mask.at[1, 0, :, -2:].set(-1e9)

        out = detr_encoder_layer(hidden, mask, pos, params, H, q_tile=q_tile)
        out = jax.block_until_ready(out)

        ref = reference(hidden, mask, pos, params, H)
        assert out.shape == (B, S, E)
        # bf16 matmul operands + approx reciprocal -> relaxed tolerance vs f32 ref.
        assert jnp.allclose(out, ref, rtol=3e-2, atol=3e-2), "mismatch vs reference"

    run_case(keys[12], keys[13], S=8, q_tile=128)   # single query tile per batch
    run_case(keys[14], keys[15], S=16, q_tile=8)    # two tiles, both grid axes parallel
    run_case(keys[16], keys[17], S=12, q_tile=8)    # padded query dim (S % tile != 0)

    print("KERNEL_OK")
</pallas_src>

<mosaic_0001>
module attributes {stable_mosaic.version = 11 : i64} {
  func.func @encoder_layer_kernel(%arg0: i32, %arg1: i32, %arg2: memref<1x8x32xf32, #tpu.memory_space<vmem>>, %arg3: memref<1x8x32xf32, #tpu.memory_space<vmem>>, %arg4: memref<1x1x8x8xbf16, #tpu.memory_space<vmem>>, %arg5: memref<1x4x8x8xbf16, #tpu.memory_space<vmem>>, %arg6: memref<1x4x8x8xbf16, #tpu.memory_space<vmem>>, %arg7: memref<32x32xbf16, #tpu.memory_space<vmem>>, %arg8: memref<32x32xbf16, #tpu.memory_space<vmem>>, %arg9: memref<32x64xbf16, #tpu.memory_space<vmem>>, %arg10: memref<64x32xbf16, #tpu.memory_space<vmem>>, %arg11: memref<7x32xf32, #tpu.memory_space<vmem>>, %arg12: memref<1x64xf32, #tpu.memory_space<vmem>>, %arg13: memref<1x8x32xf32, #tpu.memory_space<vmem>>, %arg14: memref<4x8x8xbf16, #tpu.memory_space<vmem>>, %arg15: memref<8x32xbf16, #tpu.memory_space<vmem>>) attributes {dimension_semantics = [#tpu.dimension_semantics<parallel>, #tpu.dimension_semantics<parallel>], iteration_bounds = array<i64: 2, 1>, scalar_prefetch = 0 : i64, scratch_operands = 2 : i64, tpu.core_type = #tpu.core_type<tc>, window_params = [{transform_indices = @transform_0, window_bounds = array<i64: 1, 8, 32>}, {transform_indices = @transform_1, window_bounds = array<i64: 1, 8, 32>}, {transform_indices = @transform_2, window_bounds = array<i64: 1, 1, 8, 8>}, {transform_indices = @transform_3, window_bounds = array<i64: 1, 4, 8, 8>}, {transform_indices = @transform_4, window_bounds = array<i64: 1, 4, 8, 8>}, {pipeline_mode = #tpu.pipeline_mode<synchronous>, transform_indices = @transform_5, window_bounds = array<i64: 32, 32>}, {pipeline_mode = #tpu.pipeline_mode<synchronous>, transform_indices = @transform_6, window_bounds = array<i64: 32, 32>}, {pipeline_mode = #tpu.pipeline_mode<synchronous>, transform_indices = @transform_7, window_bounds = array<i64: 32, 64>}, {pipeline_mode = #tpu.pipeline_mode<synchronous>, transform_indices = @transform_8, window_bounds = array<i64: 64, 32>}, {pipeline_mode = #tpu.pipeline_mode<synchronous>, transform_indices = @transform_9, window_bounds = array<i64: 7, 32>}, {pipeline_mode = #tpu.pipeline_mode<synchronous>, transform_indices = @transform_10, window_bounds = array<i64: 1, 64>}, {transform_indices = @transform_11, window_bounds = array<i64: 1, 8, 32>}]} {
    %c0 = arith.constant 0 : index
    %c0_0 = arith.constant 0 : index
    %0 = vector.load %arg11[%c0, %c0_0] : memref<7x32xf32, #tpu.memory_space<vmem>>, vector<7x32xf32>
    %1 = vector.extract_strided_slice %0 {offsets = [0, 0], sizes = [1, 32], strides = [1, 1]} : vector<7x32xf32> to vector<1x32xf32>
    %2 = vector.extract_strided_slice %0 {offsets = [1, 0], sizes = [1, 32], strides = [1, 1]} : vector<7x32xf32> to vector<1x32xf32>
    %3 = vector.extract_strided_slice %0 {offsets = [2, 0], sizes = [1, 32], strides = [1, 1]} : vector<7x32xf32> to vector<1x32xf32>
    %4 = vector.extract_strided_slice %0 {offsets = [3, 0], sizes = [1, 32], strides = [1, 1]} : vector<7x32xf32> to vector<1x32xf32>
    %5 = vector.extract_strided_slice %0 {offsets = [4, 0], sizes = [1, 32], strides = [1, 1]} : vector<7x32xf32> to vector<1x32xf32>
    %6 = vector.extract_strided_slice %0 {offsets = [5, 0], sizes = [1, 32], strides = [1, 1]} : vector<7x32xf32> to vector<1x32xf32>
    %7 = vector.extract_strided_slice %0 {offsets = [6, 0], sizes = [1, 32], strides = [1, 1]} : vector<7x32xf32> to vector<1x32xf32>
    %c0_1 = arith.constant 0 : index
    %c0_2 = arith.constant 0 : index
    %c0_3 = arith.constant 0 : index
    %8 = vector.load %arg2[%c0_1, %c0_2, %c0_3] : memref<1x8x32xf32, #tpu.memory_space<vmem>>, vector<1x8x32xf32>
    %9 = vector.shape_cast %8 : vector<1x8x32xf32> to vector<8x32xf32>
    %c0_4 = arith.constant 0 : index
    %c0_5 = arith.constant 0 : index
    %c0_6 = arith.constant 0 : index
    %10 = vector.load %arg3[%c0_4, %c0_5, %c0_6] : memref<1x8x32xf32, #tpu.memory_space<vmem>>, vector<1x8x32xf32>
    %11 = vector.shape_cast %10 : vector<1x8x32xf32> to vector<8x32xf32>
    %12 = arith.addf %9, %11 : vector<8x32xf32>
    %13 = arith.truncf %12 : vector<8x32xf32> to vector<8x32xbf16>
    %c0_7 = arith.constant 0 : index
    %c0_8 = arith.constant 0 : index
    %14 = vector.load %arg7[%c0_7, %c0_8] : memref<32x32xbf16, #tpu.memory_space<vmem>>, vector<32x32xbf16>
    %cst = arith.constant dense<0.000000e+00> : vector<8x32xf32>
    %15 = tpu.matmul %13, %14, %cst {dimension_numbers = #tpu.dot_dimension_numbers<[1], [0], [0], [1], [0, 0, 1, 1], [], []>} : vector<8x32xbf16>, vector<32x32xbf16>, vector<8x32xf32> -> vector<8x32xf32>
    %16 = vector.broadcast %1 : vector<1x32xf32> to vector<8x32xf32>
    %17 = arith.addf %15, %16 : vector<8x32xf32>
    %18 = arith.truncf %17 : vector<8x32xf32> to vector<8x32xbf16>
    %19 = vector.extract_strided_slice %18 {offsets = [0, 0], sizes = [8, 8], strides = [1, 1]} : vector<8x32xbf16> to vector<8x8xbf16>
    %c0_9 = arith.constant 0 : index
    %c0_10 = arith.constant 0 : index
    %c0_11 = arith.constant 0 : index
    %20 = vector.load %arg14[%c0_9, %c0_10, %c0_11] : memref<4x8x8xbf16, #tpu.memory_space<vmem>>, vector<1x8x8xbf16>
    %21 = vector.shape_cast %20 : vector<1x8x8xbf16> to vector<8x8xbf16>
    %22 = vector.shape_cast %19 : vector<8x8xbf16> to vector<1x8x8xbf16>
    tpu.vector_store %arg14[%c0_9, %c0_10, %c0_11], %22 {strides = array<i32>} : memref<4x8x8xbf16, #tpu.memory_space<vmem>>, vector<1x8x8xbf16>,
    %23 = vector.extract_strided_slice %18 {offsets = [0, 8], sizes = [8, 8], strides = [1, 1]} : vector<8x32xbf16> to vector<8x8xbf16>
    %c1 = arith.constant 1 : index
    %c0_12 = arith.constant 0 : index
    %c0_13 = arith.constant 0 : index
    %24 = vector.load %arg14[%c1, %c0_12, %c0_13] : memref<4x8x8xbf16, #tpu.memory_space<vmem>>, vector<1x8x8xbf16>
    %25 = vector.shape_cast %24 : vector<1x8x8xbf16> to vector<8x8xbf16>
    %26 = vector.shape_cast %23 : vector<8x8xbf16> to vector<1x8x8xbf16>
    tpu.vector_store %arg14[%c1, %c0_12, %c0_13], %26 {strides = array<i32>} : memref<4x8x8xbf16, #tpu.memory_space<vmem>>, vector<1x8x8xbf16>,
    %27 = vector.extract_strided_slice %18 {offsets = [0, 16], sizes = [8, 8], strides = [1, 1]} : vector<8x32xbf16> to vector<8x8xbf16>
    %c2 = arith.constant 2 : index
    %c0_14 = arith.constant 0 : index
    %c0_15 = arith.constant 0 : index
    %28 = vector.load %arg14[%c2, %c0_14, %c0_15] : memref<4x8x8xbf16, #tpu.memory_space<vmem>>, vector<1x8x8xbf16>
    %29 = vector.shape_cast %28 : vector<1x8x8xbf16> to vector<8x8xbf16>
    %30 = vector.shape_cast %27 : vector<8x8xbf16> to vector<1x8x8xbf16>
    tpu.vector_store %arg14[%c2, %c0_14, %c0_15], %30 {strides = array<i32>} : memref<4x8x8xbf16, #tpu.memory_space<vmem>>, vector<1x8x8xbf16>,
    %31 = vector.extract_strided_slice %18 {offsets = [0, 24], sizes = [8, 8], strides = [1, 1]} : vector<8x32xbf16> to vector<8x8xbf16>
    %c3 = arith.constant 3 : index
    %c0_16 = arith.constant 0 : index
    %c0_17 = arith.constant 0 : index
    %32 = vector.load %arg14[%c3, %c0_16, %c0_17] : memref<4x8x8xbf16, #tpu.memory_space<vmem>>, vector<1x8x8xbf16>
    %33 = vector.shape_cast %32 : vector<1x8x8xbf16> to vector<8x8xbf16>
    %34 = vector.shape_cast %31 : vector<8x8xbf16> to vector<1x8x8xbf16>
    tpu.vector_store %arg14[%c3, %c0_16, %c0_17], %34 {strides = array<i32>} : memref<4x8x8xbf16, #tpu.memory_space<vmem>>, vector<1x8x8xbf16>,
    %c0_18 = arith.constant 0 : index
    %c0_19 = arith.constant 0 : index
    %c0_20 = arith.constant 0 : index
    %35 = vector.load %arg14[%c0_18, %c0_19, %c0_20] : memref<4x8x8xbf16, #tpu.memory_space<vmem>>, vector<4x8x8xbf16>
    %c0_21 = arith.constant 0 : index
    %c0_22 = arith.constant 0 : index
    %c0_23 = arith.constant 0 : index
    %c0_24 = arith.constant 0 : index
    %36 = vector.load %arg5[%c0_21, %c0_22, %c0_23, %c0_24] : memref<1x4x8x8xbf16, #tpu.memory_space<vmem>>, vector<1x4x8x8xbf16>
    %37 = vector.shape_cast %36 : vector<1x4x8x8xbf16> to vector<4x8x8xbf16>
    "tpu.trace_start"() <{level = 10 : i32, message = "hqd,hds->hqs"}> : () -> ()
    %cst_25 = arith.constant dense<0.000000e+00> : vector<4x8x8xf32>
    %38 = tpu.matmul %35, %37, %cst_25 {dimension_numbers = #tpu.dot_dimension_numbers<[2], [1], [1], [2], [0, 0, 0, 1, 1, 2], [0], [0]>} : vector<4x8x8xbf16>, vector<4x8x8xbf16>, vector<4x8x8xf32> -> vector<4x8x8xf32>
    "tpu.trace_stop"() : () -> ()
    %c0_26 = arith.constant 0 : index
    %c0_27 = arith.constant 0 : index
    %c0_28 = arith.constant 0 : index
    %c0_29 = arith.constant 0 : index
    %39 = vector.load %arg4[%c0_26, %c0_27, %c0_28, %c0_29] : memref<1x1x8x8xbf16, #tpu.memory_space<vmem>>, vector<1x1x8x8xbf16>
    %40 = vector.shape_cast %39 : vector<1x1x8x8xbf16> to vector<8x8xbf16>
    %41 = arith.extf %40 : vector<8x8xbf16> to vector<8x8xf32>
    %42 = vector.shape_cast %41 : vector<8x8xf32> to vector<1x8x8xf32>
    %43 = vector.broadcast %42 : vector<1x8x8xf32> to vector<4x8x8xf32>
    %44 = arith.addf %38, %43 : vector<4x8x8xf32>
    %cst_30 = arith.constant dense<0xFF800000> : vector<4x8xf32>
    %45 = vector.multi_reduction <maximumf>, %44, %cst_30 [2] : vector<4x8x8xf32> to vector<4x8xf32>
    %46 = vector.shape_cast %45 : vector<4x8xf32> to vector<4x8x1xf32>
    %47 = vector.broadcast %46 : vector<4x8x1xf32> to vector<4x8x8xf32>
    %48 = arith.subf %44, %47 : vector<4x8x8xf32>
    %49 = math.exp %48 : vector<4x8x8xf32>
    %cst_31 = arith.constant dense<0.000000e+00> : vector<4x8xf32>
    %50 = vector.multi_reduction <add>, %49, %cst_31 [2] : vector<4x8x8xf32> to vector<4x8xf32>
    %51 = vector.shape_cast %50 : vector<4x8xf32> to vector<4x8x1xf32>
    %52 = tpu.reciprocal %51 {approx = true} : vector<4x8x1xf32> -> vector<4x8x1xf32>
    %53 = vector.broadcast %52 : vector<4x8x1xf32> to vector<4x8x8xf32>
    %54 = arith.mulf %49, %53 : vector<4x8x8xf32>
    %55 = arith.truncf %54 : vector<4x8x8xf32> to vector<4x8x8xbf16>
    %c0_32 = arith.constant 0 : index
    %c0_33 = arith.constant 0 : index
    %c0_34 = arith.constant 0 : index
    %c0_35 = arith.constant 0 : index
    %56 = vector.load %arg6[%c0_32, %c0_33, %c0_34, %c0_35] : memref<1x4x8x8xbf16, #tpu.memory_space<vmem>>, vector<1x4x8x8xbf16>
    %57 = vector.shape_cast %56 : vector<1x4x8x8xbf16> to vector<4x8x8xbf16>
    "tpu.trace_start"() <{level = 10 : i32, message = "hqs,hsd->hqd"}> : () -> ()
    %cst_36 = arith.constant dense<0.000000e+00> : vector<4x8x8xf32>
    %58 = tpu.matmul %55, %57, %cst_36 {dimension_numbers = #tpu.dot_dimension_numbers<[2], [1], [1], [2], [0, 0, 0, 1, 1, 2], [0], [0]>} : vector<4x8x8xbf16>, vector<4x8x8xbf16>, vector<4x8x8xf32> -> vector<4x8x8xf32>
    "tpu.trace_stop"() : () -> ()
    %59 = vector.extract_strided_slice %58 {offsets = [0, 0, 0], sizes = [1, 8, 8], strides = [1, 1, 1]} : vector<4x8x8xf32> to vector<1x8x8xf32>
    %60 = vector.shape_cast %59 : vector<1x8x8xf32> to vector<8x8xf32>
    %61 = arith.truncf %60 : vector<8x8xf32> to vector<8x8xbf16>
    %c0_37 = arith.constant 0 : index
    %c0_38 = arith.constant 0 : index
    %62 = vector.load %arg15[%c0_37, %c0_38] : memref<8x32xbf16, #tpu.memory_space<vmem>>, vector<8x8xbf16>
    tpu.vector_store %arg15[%c0_37, %c0_38], %61 {strides = array<i32>} : memref<8x32xbf16, #tpu.memory_space<vmem>>, vector<8x8xbf16>,
    %63 = vector.extract_strided_slice %58 {offsets = [1, 0, 0], sizes = [1, 8, 8], strides = [1, 1, 1]} : vector<4x8x8xf32> to vector<1x8x8xf32>
    %64 = vector.shape_cast %63 : vector<1x8x8xf32> to vector<8x8xf32>
    %65 = arith.truncf %64 : vector<8x8xf32> to vector<8x8xbf16>
    %c0_39 = arith.constant 0 : index
    %c8 = arith.constant 8 : index
    %66 = vector.load %arg15[%c0_39, %c8] : memref<8x32xbf16, #tpu.memory_space<vmem>>, vector<8x8xbf16>
    tpu.vector_store %arg15[%c0_39, %c8], %65 {strides = array<i32>} : memref<8x32xbf16, #tpu.memory_space<vmem>>, vector<8x8xbf16>,
    %67 = vector.extract_strided_slice %58 {offsets = [2, 0, 0], sizes = [1, 8, 8], strides = [1, 1, 1]} : vector<4x8x8xf32> to vector<1x8x8xf32>
    %68 = vector.shape_cast %67 : vector<1x8x8xf32> to vector<8x8xf32>
    %69 = arith.truncf %68 : vector<8x8xf32> to vector<8x8xbf16>
    %c0_40 = arith.constant 0 : index
    %c16 = arith.constant 16 : index
    %70 = vector.load %arg15[%c0_40, %c16] : memref<8x32xbf16, #tpu.memory_space<vmem>>, vector<8x8xbf16>
    tpu.vector_store %arg15[%c0_40, %c16], %69 {strides = array<i32>} : memref<8x32xbf16, #tpu.memory_space<vmem>>, vector<8x8xbf16>,
    %71 = vector.extract_strided_slice %58 {offsets = [3, 0, 0], sizes = [1, 8, 8], strides = [1, 1, 1]} : vector<4x8x8xf32> to vector<1x8x8xf32>
    %72 = vector.shape_cast %71 : vector<1x8x8xf32> to vector<8x8xf32>
    %73 = arith.truncf %72 : vector<8x8xf32> to vector<8x8xbf16>
    %c0_41 = arith.constant 0 : index
    %c24 = arith.constant 24 : index
    %74 = vector.load %arg15[%c0_41, %c24] : memref<8x32xbf16, #tpu.memory_space<vmem>>, vector<8x8xbf16>
    tpu.vector_store %arg15[%c0_41, %c24], %73 {strides = array<i32>} : memref<8x32xbf16, #tpu.memory_space<vmem>>, vector<8x8xbf16>,
    %c0_42 = arith.constant 0 : index
    %c0_43 = arith.constant 0 : index
    %75 = vector.load %arg15[%c0_42, %c0_43] : memref<8x32xbf16, #tpu.memory_space<vmem>>, vector<8x32xbf16>
    %c0_44 = arith.constant 0 : index
    %c0_45 = arith.constant 0 : index
    %76 = vector.load %arg8[%c0_44, %c0_45] : memref<32x32xbf16, #tpu.memory_space<vmem>>, vector<32x32xbf16>
    %cst_46 = arith.constant dense<0.000000e+00> : vector<8x32xf32>
    %77 = tpu.matmul %75, %76, %cst_46 {dimension_numbers = #tpu.dot_dimension_numbers<[1], [0], [0], [1], [0, 0, 1, 1], [], []>} : vector<8x32xbf16>, vector<32x32xbf16>, vector<8x32xf32> -> vector<8x32xf32>
    %78 = vector.broadcast %2 : vector<1x32xf32> to vector<8x32xf32>
    %79 = arith.addf %77, %78 : vector<8x32xf32>
    %80 = arith.addf %9, %79 : vector<8x32xf32>
    %cst_47 = arith.constant dense<0.000000e+00> : vector<8xf32>
    %81 = vector.multi_reduction <add>, %80, %cst_47 [1] : vector<8x32xf32> to vector<8xf32>
    %82 = vector.shape_cast %81 : vector<8xf32> to vector<8x1xf32>
    %cst_48 = arith.constant 3.200000e+01 : f32
    %83 = vector.broadcast %cst_48 : f32 to vector<8x1xf32>
    %84 = arith.divf %82, %83 : vector<8x1xf32>
    %85 = vector.broadcast %84 : vector<8x1xf32> to vector<8x32xf32>
    %86 = arith.subf %80, %85 : vector<8x32xf32>
    %87 = arith.mulf %86, %86 : vector<8x32xf32>
    %cst_49 = arith.constant dense<0.000000e+00> : vector<8xf32>
    %88 = vector.multi_reduction <add>, %87, %cst_49 [1] : vector<8x32xf32> to vector<8xf32>
    %89 = vector.shape_cast %88 : vector<8xf32> to vector<8x1xf32>
    %cst_50 = arith.constant 3.200000e+01 : f32
    %90 = vector.broadcast %cst_50 : f32 to vector<8x1xf32>
    %91 = arith.divf %89, %90 : vector<8x1xf32>
    %92 = vector.broadcast %84 : vector<8x1xf32> to vector<8x32xf32>
    %93 = arith.subf %80, %92 : vector<8x32xf32>
    %cst_51 = arith.constant 9.99999974E-6 : f32
    %94 = vector.broadcast %cst_51 : f32 to vector<8x1xf32>
    %95 = arith.addf %91, %94 : vector<8x1xf32>
    %96 = math.rsqrt %95 : vector<8x1xf32>
    %97 = vector.broadcast %96 : vector<8x1xf32> to vector<8x32xf32>
    %98 = arith.mulf %93, %97 : vector<8x32xf32>
    %99 = vector.broadcast %3 : vector<1x32xf32> to vector<8x32xf32>
    %100 = arith.mulf %98, %99 : vector<8x32xf32>
    %101 = vector.broadcast %4 : vector<1x32xf32> to vector<8x32xf32>
    %102 = arith.addf %100, %101 : vector<8x32xf32>
    %103 = arith.truncf %102 : vector<8x32xf32> to vector<8x32xbf16>
    %c0_52 = arith.constant 0 : index
    %c0_53 = arith.constant 0 : index
    %104 = vector.load %arg9[%c0_52, %c0_53] : memref<32x64xbf16, #tpu.memory_space<vmem>>, vector<32x64xbf16>
    %cst_54 = arith.constant dense<0.000000e+00> : vector<8x64xf32>
    %105 = tpu.matmul %103, %104, %cst_54 {dimension_numbers = #tpu.dot_dimension_numbers<[1], [0], [0], [1], [0, 0, 1, 1], [], []>} : vector<8x32xbf16>, vector<32x64xbf16>, vector<8x64xf32> -> vector<8x64xf32>
    %c0_55 = arith.constant 0 : index
    %c0_56 = arith.constant 0 : index
    %106 = vector.load %arg12[%c0_55, %c0_56] : memref<1x64xf32, #tpu.memory_space<vmem>>, vector<1x64xf32>
    %107 = vector.broadcast %106 : vector<1x64xf32> to vector<8x64xf32>
    %108 = arith.addf %105, %107 : vector<8x64xf32>
    %cst_57 = arith.constant 5.000000e-01 : f32
    %109 = vector.broadcast %cst_57 : f32 to vector<8x64xf32>
    %110 = arith.mulf %109, %108 : vector<8x64xf32>
    %cst_58 = arith.constant 0.707106769 : f32
    %111 = vector.broadcast %cst_58 : f32 to vector<8x64xf32>
    %112 = arith.mulf %108, %111 : vector<8x64xf32>
    %113 = math.erf %112 : vector<8x64xf32>
    %cst_59 = arith.constant 1.000000e+00 : f32
    %114 = vector.broadcast %cst_59 : f32 to vector<8x64xf32>
    %115 = arith.addf %114, %113 : vector<8x64xf32>
    %116 = arith.mulf %110, %115 : vector<8x64xf32>
    %117 = arith.truncf %116 : vector<8x64xf32> to vector<8x64xbf16>
    %c0_60 = arith.constant 0 : index
    %c0_61 = arith.constant 0 : index
    %118 = vector.load %arg10[%c0_60, %c0_61] : memref<64x32xbf16, #tpu.memory_space<vmem>>, vector<64x32xbf16>
    %cst_62 = arith.constant dense<0.000000e+00> : vector<8x32xf32>
    %119 = tpu.matmul %117, %118, %cst_62 {dimension_numbers = #tpu.dot_dimension_numbers<[1], [0], [0], [1], [0, 0, 1, 1], [], []>} : vector<8x64xbf16>, vector<64x32xbf16>, vector<8x32xf32> -> vector<8x32xf32>
    %120 = vector.broadcast %7 : vector<1x32xf32> to vector<8x32xf32>
    %121 = arith.addf %119, %120 : vector<8x32xf32>
    %122 = arith.addf %102, %121 : vector<8x32xf32>
    %cst_63 = arith.constant dense<0.000000e+00> : vector<8xf32>
    %123 = vector.multi_reduction <add>, %122, %cst_63 [1] : vector<8x32xf32> to vector<8xf32>
    %124 = vector.shape_cast %123 : vector<8xf32> to vector<8x1xf32>
    %cst_64 = arith.constant 3.200000e+01 : f32
    %125 = vector.broadcast %cst_64 : f32 to vector<8x1xf32>
    %126 = arith.divf %124, %125 : vector<8x1xf32>
    %127 = vector.broadcast %126 : vector<8x1xf32> to vector<8x32xf32>
    %128 = arith.subf %122, %127 : vector<8x32xf32>
    %129 = arith.mulf %128, %128 : vector<8x32xf32>
    %cst_65 = arith.constant dense<0.000000e+00> : vector<8xf32>
    %130 = vector.multi_reduction <add>, %129, %cst_65 [1] : vector<8x32xf32> to vector<8xf32>
    %131 = vector.shape_cast %130 : vector<8xf32> to vector<8x1xf32>
    %cst_66 = arith.constant 3.200000e+01 : f32
    %132 = vector.broadcast %cst_66 : f32 to vector<8x1xf32>
    %133 = arith.divf %131, %132 : vector<8x1xf32>
    %134 = vector.broadcast %126 : vector<8x1xf32> to vector<8x32xf32>
    %135 = arith.subf %122, %134 : vector<8x32xf32>
    %cst_67 = arith.constant 9.99999974E-6 : f32
    %136 = vector.broadcast %cst_67 : f32 to vector<8x1xf32>
    %137 = arith.addf %133, %136 : vector<8x1xf32>
    %138 = math.rsqrt %137 : vector<8x1xf32>
    %139 = vector.broadcast %138 : vector<8x1xf32> to vector<8x32xf32>
    %140 = arith.mulf %135, %139 : vector<8x32xf32>
    %141 = vector.broadcast %5 : vector<1x32xf32> to vector<8x32xf32>
    %142 = arith.mulf %140, %141 : vector<8x32xf32>
    %143 = vector.broadcast %6 : vector<1x32xf32> to vector<8x32xf32>
    %144 = arith.addf %142, %143 : vector<8x32xf32>
    %c0_68 = arith.constant 0 : index
    %c0_69 = arith.constant 0 : index
    %c0_70 = arith.constant 0 : index
    %145 = vector.load %arg13[%c0_68, %c0_69, %c0_70] : memref<1x8x32xf32, #tpu.memory_space<vmem>>, vector<1x8x32xf32>
    %146 = vector.shape_cast %145 : vector<1x8x32xf32> to vector<8x32xf32>
    %147 = vector.shape_cast %144 : vector<8x32xf32> to vector<1x8x32xf32>
    tpu.vector_store %arg13[%c0_68, %c0_69, %c0_70], %147 {strides = array<i32>} : memref<1x8x32xf32, #tpu.memory_space<vmem>>, vector<1x8x32xf32>,
    return
  }
  func.func @transform_0(%arg0: i32, %arg1: i32) -> (i32, i32, i32) {
    %c0_i32 = arith.constant 0 : i32
    %c0_i32_0 = arith.constant 0 : i32
    return %arg0, %arg1, %c0_i32 : i32, i32, i32
  }
  func.func @transform_1(%arg0: i32, %arg1: i32) -> (i32, i32, i32) {
    %c0_i32 = arith.constant 0 : i32
    %c0_i32_0 = arith.constant 0 : i32
    return %arg0, %arg1, %c0_i32 : i32, i32, i32
  }
  func.func @transform_2(%arg0: i32, %arg1: i32) -> (i32, i32, i32, i32) {
    %c0_i32 = arith.constant 0 : i32
    %c0_i32_0 = arith.constant 0 : i32
    %c0_i32_1 = arith.constant 0 : i32
    return %arg0, %c0_i32, %arg1, %c0_i32_0 : i32, i32, i32, i32
  }
  func.func @transform_3(%arg0: i32, %arg1: i32) -> (i32, i32, i32, i32) {
    %c0_i32 = arith.constant 0 : i32
    %c0_i32_0 = arith.constant 0 : i32
    %c0_i32_1 = arith.constant 0 : i32
    %c0_i32_2 = arith.constant 0 : i32
    return %arg0, %c0_i32, %c0_i32_0, %c0_i32_1 : i32, i32, i32, i32
  }
  func.func @transform_4(%arg0: i32, %arg1: i32) -> (i32, i32, i32, i32) {
    %c0_i32 = arith.constant 0 : i32
    %c0_i32_0 = arith.constant 0 : i32
    %c0_i32_1 = arith.constant 0 : i32
    %c0_i32_2 = arith.constant 0 : i32
    return %arg0, %c0_i32, %c0_i32_0, %c0_i32_1 : i32, i32, i32, i32
  }
  func.func @transform_5(%arg0: i32, %arg1: i32) -> (i32, i32) {
    %c0_i32 = arith.constant 0 : i32
    %c0_i32_0 = arith.constant 0 : i32
    %c0_i32_1 = arith.constant 0 : i32
    return %c0_i32, %c0_i32_0 : i32, i32
  }
  func.func @transform_6(%arg0: i32, %arg1: i32) -> (i32, i32) {
    %c0_i32 = arith.constant 0 : i32
    %c0_i32_0 = arith.constant 0 : i32
    %c0_i32_1 = arith.constant 0 : i32
    return %c0_i32, %c0_i32_0 : i32, i32
  }
  func.func @transform_7(%arg0: i32, %arg1: i32) -> (i32, i32) {
    %c0_i32 = arith.constant 0 : i32
    %c0_i32_0 = arith.constant 0 : i32
    %c0_i32_1 = arith.constant 0 : i32
    return %c0_i32, %c0_i32_0 : i32, i32
  }
  func.func @transform_8(%arg0: i32, %arg1: i32) -> (i32, i32) {
    %c0_i32 = arith.constant 0 : i32
    %c0_i32_0 = arith.constant 0 : i32
    %c0_i32_1 = arith.constant 0 : i32
    return %c0_i32, %c0_i32_0 : i32, i32
  }
  func.func @transform_9(%arg0: i32, %arg1: i32) -> (i32, i32) {
    %c0_i32 = arith.constant 0 : i32
    %c0_i32_0 = arith.constant 0 : i32
    %c0_i32_1 = arith.constant 0 : i32
    return %c0_i32, %c0_i32_0 : i32, i32
  }
  func.func @transform_10(%arg0: i32, %arg1: i32) -> (i32, i32) {
    %c0_i32 = arith.constant 0 : i32
    %c0_i32_0 = arith.constant 0 : i32
    %c0_i32_1 = arith.constant 0 : i32
    return %c0_i32, %c0_i32_0 : i32, i32
  }
  func.func @transform_11(%arg0: i32, %arg1: i32) -> (i32, i32, i32) {
    %c0_i32 = arith.constant 0 : i32
    %c0_i32_0 = arith.constant 0 : i32
    return %arg0, %arg1, %c0_i32 : i32, i32, i32
  }
}

module attributes {stable_mosaic.version = 11 : i64} {
  func.func @encoder_layer_kernel(%arg0: i32, %arg1: i32, %arg2: memref<1x8x32xf32, #tpu.memory_space<vmem>>, %arg3: memref<1x8x32xf32, #tpu.memory_space<vmem>>, %arg4: memref<1x1x8x8xbf16, #tpu.memory_space<vmem>>, %arg5: memref<1x4x8x8xbf16, #tpu.memory_space<vmem>>, %arg6: memref<1x4x8x8xbf16, #tpu.memory_space<vmem>>, %arg7: memref<32x32xbf16, #tpu.memory_space<vmem>>, %arg8: memref<32x32xbf16, #tpu.memory_space<vmem>>, %arg9: memref<32x64xbf16, #tpu.memory_space<vmem>>, %arg10: memref<64x32xbf16, #tpu.memory_space<vmem>>, %arg11: memref<7x32xf32, #tpu.memory_space<vmem>>, %arg12: memref<1x64xf32, #tpu.memory_space<vmem>>, %arg13: memref<1x8x32xf32, #tpu.memory_space<vmem>>, %arg14: memref<4x8x8xbf16, #tpu.memory_space<vmem>>, %arg15: memref<8x32xbf16, #tpu.memory_space<vmem>>) attributes {dimension_semantics = [#tpu.dimension_semantics<parallel>, #tpu.dimension_semantics<parallel>], iteration_bounds = array<i64: 2, 1>, scalar_prefetch = 0 : i64, scratch_operands = 2 : i64, tpu.core_type = #tpu.core_type<tc>, window_params = [{transform_indices = @transform_0, window_bounds = array<i64: 1, 8, 32>}, {transform_indices = @transform_1, window_bounds = array<i64: 1, 8, 32>}, {transform_indices = @transform_2, window_bounds = array<i64: 1, 1, 8, 8>}, {transform_indices = @transform_3, window_bounds = array<i64: 1, 4, 8, 8>}, {transform_indices = @transform_4, window_bounds = array<i64: 1, 4, 8, 8>}, {pipeline_mode = #tpu.pipeline_mode<synchronous>, transform_indices = @transform_5, window_bounds = array<i64: 32, 32>}, {pipeline_mode = #tpu.pipeline_mode<synchronous>, transform_indices = @transform_6, window_bounds = array<i64: 32, 32>}, {pipeline_mode = #tpu.pipeline_mode<synchronous>, transform_indices = @transform_7, window_bounds = array<i64: 32, 64>}, {pipeline_mode = #tpu.pipeline_mode<synchronous>, transform_indices = @transform_8, window_bounds = array<i64: 64, 32>}, {pipeline_mode = #tpu.pipeline_mode<synchronous>, transform_indices = @transform_9, window_bounds = array<i64: 7, 32>}, {pipeline_mode = #tpu.pipeline_mode<synchronous>, transform_indices = @transform_10, window_bounds = array<i64: 1, 64>}, {transform_indices = @transform_11, window_bounds = array<i64: 1, 8, 32>}]} {
    %c0 = arith.constant 0 : index
    %c0_0 = arith.constant 0 : index
    %0 = vector.load %arg11[%c0, %c0_0] : memref<7x32xf32, #tpu.memory_space<vmem>>, vector<7x32xf32>
    %1 = vector.extract_strided_slice %0 {offsets = [0, 0], sizes = [1, 32], strides = [1, 1]} : vector<7x32xf32> to vector<1x32xf32>
    %2 = vector.extract_strided_slice %0 {offsets = [1, 0], sizes = [1, 32], strides = [1, 1]} : vector<7x32xf32> to vector<1x32xf32>
    %3 = vector.extract_strided_slice %0 {offsets = [2, 0], sizes = [1, 32], strides = [1, 1]} : vector<7x32xf32> to vector<1x32xf32>
    %4 = vector.extract_strided_slice %0 {offsets = [3, 0], sizes = [1, 32], strides = [1, 1]} : vector<7x32xf32> to vector<1x32xf32>
    %5 = vector.extract_strided_slice %0 {offsets = [4, 0], sizes = [1, 32], strides = [1, 1]} : vector<7x32xf32> to vector<1x32xf32>
    %6 = vector.extract_strided_slice %0 {offsets = [5, 0], sizes = [1, 32], strides = [1, 1]} : vector<7x32xf32> to vector<1x32xf32>
    %7 = vector.extract_strided_slice %0 {offsets = [6, 0], sizes = [1, 32], strides = [1, 1]} : vector<7x32xf32> to vector<1x32xf32>
    %c0_1 = arith.constant 0 : index
    %c0_2 = arith.constant 0 : index
    %c0_3 = arith.constant 0 : index
    %8 = vector.load %arg2[%c0_1, %c0_2, %c0_3] : memref<1x8x32xf32, #tpu.memory_space<vmem>>, vector<1x8x32xf32>
    %9 = vector.shape_cast %8 : vector<1x8x32xf32> to vector<8x32xf32>
    %c0_4 = arith.constant 0 : index
    %c0_5 = arith.constant 0 : index
    %c0_6 = arith.constant 0 : index
    %10 = vector.load %arg3[%c0_4, %c0_5, %c0_6] : memref<1x8x32xf32, #tpu.memory_space<vmem>>, vector<1x8x32xf32>
    %11 = vector.shape_cast %10 : vector<1x8x32xf32> to vector<8x32xf32>
    %12 = arith.addf %9, %11 : vector<8x32xf32>
    %13 = arith.truncf %12 : vector<8x32xf32> to vector<8x32xbf16>
    %c0_7 = arith.constant 0 : index
    %c0_8 = arith.constant 0 : index
    %14 = vector.load %arg7[%c0_7, %c0_8] : memref<32x32xbf16, #tpu.memory_space<vmem>>, vector<32x32xbf16>
    %cst = arith.constant dense<0.000000e+00> : vector<8x32xf32>
    %15 = tpu.matmul %13, %14, %cst {dimension_numbers = #tpu.dot_dimension_numbers<[1], [0], [0], [1], [0, 0, 1, 1], [], []>} : vector<8x32xbf16>, vector<32x32xbf16>, vector<8x32xf32> -> vector<8x32xf32>
    %16 = vector.broadcast %1 : vector<1x32xf32> to vector<8x32xf32>
    %17 = arith.addf %15, %16 : vector<8x32xf32>
    %18 = arith.truncf %17 : vector<8x32xf32> to vector<8x32xbf16>
    %19 = vector.extract_strided_slice %18 {offsets = [0, 0], sizes = [8, 8], strides = [1, 1]} : vector<8x32xbf16> to vector<8x8xbf16>
    %c0_9 = arith.constant 0 : index
    %c0_10 = arith.constant 0 : index
    %c0_11 = arith.constant 0 : index
    %20 = vector.load %arg14[%c0_9, %c0_10, %c0_11] : memref<4x8x8xbf16, #tpu.memory_space<vmem>>, vector<1x8x8xbf16>
    %21 = vector.shape_cast %20 : vector<1x8x8xbf16> to vector<8x8xbf16>
    %22 = vector.shape_cast %19 : vector<8x8xbf16> to vector<1x8x8xbf16>
    tpu.vector_store %arg14[%c0_9, %c0_10, %c0_11], %22 {strides = array<i32>} : memref<4x8x8xbf16, #tpu.memory_space<vmem>>, vector<1x8x8xbf16>,
    %23 = vector.extract_strided_slice %18 {offsets = [0, 8], sizes = [8, 8], strides = [1, 1]} : vector<8x32xbf16> to vector<8x8xbf16>
    %c1 = arith.constant 1 : index
    %c0_12 = arith.constant 0 : index
    %c0_13 = arith.constant 0 : index
    %24 = vector.load %arg14[%c1, %c0_12, %c0_13] : memref<4x8x8xbf16, #tpu.memory_space<vmem>>, vector<1x8x8xbf16>
    %25 = vector.shape_cast %24 : vector<1x8x8xbf16> to vector<8x8xbf16>
    %26 = vector.shape_cast %23 : vector<8x8xbf16> to vector<1x8x8xbf16>
    tpu.vector_store %arg14[%c1, %c0_12, %c0_13], %26 {strides = array<i32>} : memref<4x8x8xbf16, #tpu.memory_space<vmem>>, vector<1x8x8xbf16>,
    %27 = vector.extract_strided_slice %18 {offsets = [0, 16], sizes = [8, 8], strides = [1, 1]} : vector<8x32xbf16> to vector<8x8xbf16>
    %c2 = arith.constant 2 : index
    %c0_14 = arith.constant 0 : index
    %c0_15 = arith.constant 0 : index
    %28 = vector.load %arg14[%c2, %c0_14, %c0_15] : memref<4x8x8xbf16, #tpu.memory_space<vmem>>, vector<1x8x8xbf16>
    %29 = vector.shape_cast %28 : vector<1x8x8xbf16> to vector<8x8xbf16>
    %30 = vector.shape_cast %27 : vector<8x8xbf16> to vector<1x8x8xbf16>
    tpu.vector_store %arg14[%c2, %c0_14, %c0_15], %30 {strides = array<i32>} : memref<4x8x8xbf16, #tpu.memory_space<vmem>>, vector<1x8x8xbf16>,
    %31 = vector.extract_strided_slice %18 {offsets = [0, 24], sizes = [8, 8], strides = [1, 1]} : vector<8x32xbf16> to vector<8x8xbf16>
    %c3 = arith.constant 3 : index
    %c0_16 = arith.constant 0 : index
    %c0_17 = arith.constant 0 : index
    %32 = vector.load %arg14[%c3, %c0_16, %c0_17] : memref<4x8x8xbf16, #tpu.memory_space<vmem>>, vector<1x8x8xbf16>
    %33 = vector.shape_cast %32 : vector<1x8x8xbf16> to vector<8x8xbf16>
    %34 = vector.shape_cast %31 : vector<8x8xbf16> to vector<1x8x8xbf16>
    tpu.vector_store %arg14[%c3, %c0_16, %c0_17], %34 {strides = array<i32>} : memref<4x8x8xbf16, #tpu.memory_space<vmem>>, vector<1x8x8xbf16>,
    %c0_18 = arith.constant 0 : index
    %c0_19 = arith.constant 0 : index
    %c0_20 = arith.constant 0 : index
    %35 = vector.load %arg14[%c0_18, %c0_19, %c0_20] : memref<4x8x8xbf16, #tpu.memory_space<vmem>>, vector<4x8x8xbf16>
    %c0_21 = arith.constant 0 : index
    %c0_22 = arith.constant 0 : index
    %c0_23 = arith.constant 0 : index
    %c0_24 = arith.constant 0 : index
    %36 = vector.load %arg5[%c0_21, %c0_22, %c0_23, %c0_24] : memref<1x4x8x8xbf16, #tpu.memory_space<vmem>>, vector<1x4x8x8xbf16>
    %37 = vector.shape_cast %36 : vector<1x4x8x8xbf16> to vector<4x8x8xbf16>
    "tpu.trace_start"() <{level = 10 : i32, message = "hqd,hds->hqs"}> : () -> ()
    %cst_25 = arith.constant dense<0.000000e+00> : vector<4x8x8xf32>
    %38 = tpu.matmul %35, %37, %cst_25 {dimension_numbers = #tpu.dot_dimension_numbers<[2], [1], [1], [2], [0, 0, 0, 1, 1, 2], [0], [0]>} : vector<4x8x8xbf16>, vector<4x8x8xbf16>, vector<4x8x8xf32> -> vector<4x8x8xf32>
    "tpu.trace_stop"() : () -> ()
    %c0_26 = arith.constant 0 : index
    %c0_27 = arith.constant 0 : index
    %c0_28 = arith.constant 0 : index
    %c0_29 = arith.constant 0 : index
    %39 = vector.load %arg4[%c0_26, %c0_27, %c0_28, %c0_29] : memref<1x1x8x8xbf16, #tpu.memory_space<vmem>>, vector<1x1x8x8xbf16>
    %40 = vector.shape_cast %39 : vector<1x1x8x8xbf16> to vector<8x8xbf16>
    %41 = arith.extf %40 : vector<8x8xbf16> to vector<8x8xf32>
    %42 = vector.shape_cast %41 : vector<8x8xf32> to vector<1x8x8xf32>
    %43 = vector.broadcast %42 : vector<1x8x8xf32> to vector<4x8x8xf32>
    %44 = arith.addf %38, %43 : vector<4x8x8xf32>
    %cst_30 = arith.constant dense<0xFF800000> : vector<4x8xf32>
    %45 = vector.multi_reduction <maximumf>, %44, %cst_30 [2] : vector<4x8x8xf32> to vector<4x8xf32>
    %46 = vector.shape_cast %45 : vector<4x8xf32> to vector<4x8x1xf32>
    %47 = vector.broadcast %46 : vector<4x8x1xf32> to vector<4x8x8xf32>
    %48 = arith.subf %44, %47 : vector<4x8x8xf32>
    %49 = math.exp %48 : vector<4x8x8xf32>
    %cst_31 = arith.constant dense<0.000000e+00> : vector<4x8xf32>
    %50 = vector.multi_reduction <add>, %49, %cst_31 [2] : vector<4x8x8xf32> to vector<4x8xf32>
    %51 = vector.shape_cast %50 : vector<4x8xf32> to vector<4x8x1xf32>
    %52 = tpu.reciprocal %51 {approx = true} : vector<4x8x1xf32> -> vector<4x8x1xf32>
    %53 = vector.broadcast %52 : vector<4x8x1xf32> to vector<4x8x8xf32>
    %54 = arith.mulf %49, %53 : vector<4x8x8xf32>
    %55 = arith.truncf %54 : vector<4x8x8xf32> to vector<4x8x8xbf16>
    %c0_32 = arith.constant 0 : index
    %c0_33 = arith.constant 0 : index
    %c0_34 = arith.constant 0 : index
    %c0_35 = arith.constant 0 : index
    %56 = vector.load %arg6[%c0_32, %c0_33, %c0_34, %c0_35] : memref<1x4x8x8xbf16, #tpu.memory_space<vmem>>, vector<1x4x8x8xbf16>
    %57 = vector.shape_cast %56 : vector<1x4x8x8xbf16> to vector<4x8x8xbf16>
    "tpu.trace_start"() <{level = 10 : i32, message = "hqs,hsd->hqd"}> : () -> ()
    %cst_36 = arith.constant dense<0.000000e+00> : vector<4x8x8xf32>
    %58 = tpu.matmul %55, %57, %cst_36 {dimension_numbers = #tpu.dot_dimension_numbers<[2], [1], [1], [2], [0, 0, 0, 1, 1, 2], [0], [0]>} : vector<4x8x8xbf16>, vector<4x8x8xbf16>, vector<4x8x8xf32> -> vector<4x8x8xf32>
    "tpu.trace_stop"() : () -> ()
    %59 = vector.extract_strided_slice %58 {offsets = [0, 0, 0], sizes = [1, 8, 8], strides = [1, 1, 1]} : vector<4x8x8xf32> to vector<1x8x8xf32>
    %60 = vector.shape_cast %59 : vector<1x8x8xf32> to vector<8x8xf32>
    %61 = arith.truncf %60 : vector<8x8xf32> to vector<8x8xbf16>
    %c0_37 = arith.constant 0 : index
    %c0_38 = arith.constant 0 : index
    %62 = vector.load %arg15[%c0_37, %c0_38] : memref<8x32xbf16, #tpu.memory_space<vmem>>, vector<8x8xbf16>
    tpu.vector_store %arg15[%c0_37, %c0_38], %61 {strides = array<i32>} : memref<8x32xbf16, #tpu.memory_space<vmem>>, vector<8x8xbf16>,
    %63 = vector.extract_strided_slice %58 {offsets = [1, 0, 0], sizes = [1, 8, 8], strides = [1, 1, 1]} : vector<4x8x8xf32> to vector<1x8x8xf32>
    %64 = vector.shape_cast %63 : vector<1x8x8xf32> to vector<8x8xf32>
    %65 = arith.truncf %64 : vector<8x8xf32> to vector<8x8xbf16>
    %c0_39 = arith.constant 0 : index
    %c8 = arith.constant 8 : index
    %66 = vector.load %arg15[%c0_39, %c8] : memref<8x32xbf16, #tpu.memory_space<vmem>>, vector<8x8xbf16>
    tpu.vector_store %arg15[%c0_39, %c8], %65 {strides = array<i32>} : memref<8x32xbf16, #tpu.memory_space<vmem>>, vector<8x8xbf16>,
    %67 = vector.extract_strided_slice %58 {offsets = [2, 0, 0], sizes = [1, 8, 8], strides = [1, 1, 1]} : vector<4x8x8xf32> to vector<1x8x8xf32>
    %68 = vector.shape_cast %67 : vector<1x8x8xf32> to vector<8x8xf32>
    %69 = arith.truncf %68 : vector<8x8xf32> to vector<8x8xbf16>
    %c0_40 = arith.constant 0 : index
    %c16 = arith.constant 16 : index
    %70 = vector.load %arg15[%c0_40, %c16] : memref<8x32xbf16, #tpu.memory_space<vmem>>, vector<8x8xbf16>
    tpu.vector_store %arg15[%c0_40, %c16], %69 {strides = array<i32>} : memref<8x32xbf16, #tpu.memory_space<vmem>>, vector<8x8xbf16>,
    %71 = vector.extract_strided_slice %58 {offsets = [3, 0, 0], sizes = [1, 8, 8], strides = [1, 1, 1]} : vector<4x8x8xf32> to vector<1x8x8xf32>
    %72 = vector.shape_cast %71 : vector<1x8x8xf32> to vector<8x8xf32>
    %73 = arith.truncf %72 : vector<8x8xf32> to vector<8x8xbf16>
    %c0_41 = arith.constant 0 : index
    %c24 = arith.constant 24 : index
    %74 = vector.load %arg15[%c0_41, %c24] : memref<8x32xbf16, #tpu.memory_space<vmem>>, vector<8x8xbf16>
    tpu.vector_store %arg15[%c0_41, %c24], %73 {strides = array<i32>} : memref<8x32xbf16, #tpu.memory_space<vmem>>, vector<8x8xbf16>,
    %c0_42 = arith.constant 0 : index
    %c0_43 = arith.constant 0 : index
    %75 = vector.load %arg15[%c0_42, %c0_43] : memref<8x32xbf16, #tpu.memory_space<vmem>>, vector<8x32xbf16>
    %c0_44 = arith.constant 0 : index
    %c0_45 = arith.constant 0 : index
    %76 = vector.load %arg8[%c0_44, %c0_45] : memref<32x32xbf16, #tpu.memory_space<vmem>>, vector<32x32xbf16>
    %cst_46 = arith.constant dense<0.000000e+00> : vector<8x32xf32>
    %77 = tpu.matmul %75, %76, %cst_46 {dimension_numbers = #tpu.dot_dimension_numbers<[1], [0], [0], [1], [0, 0, 1, 1], [], []>} : vector<8x32xbf16>, vector<32x32xbf16>, vector<8x32xf32> -> vector<8x32xf32>
    %78 = vector.broadcast %2 : vector<1x32xf32> to vector<8x32xf32>
    %79 = arith.addf %77, %78 : vector<8x32xf32>
    %80 = arith.addf %9, %79 : vector<8x32xf32>
    %cst_47 = arith.constant dense<0.000000e+00> : vector<8xf32>
    %81 = vector.multi_reduction <add>, %80, %cst_47 [1] : vector<8x32xf32> to vector<8xf32>
    %82 = vector.shape_cast %81 : vector<8xf32> to vector<8x1xf32>
    %cst_48 = arith.constant 3.200000e+01 : f32
    %83 = vector.broadcast %cst_48 : f32 to vector<8x1xf32>
    %84 = arith.divf %82, %83 : vector<8x1xf32>
    %85 = vector.broadcast %84 : vector<8x1xf32> to vector<8x32xf32>
    %86 = arith.subf %80, %85 : vector<8x32xf32>
    %87 = arith.mulf %86, %86 : vector<8x32xf32>
    %cst_49 = arith.constant dense<0.000000e+00> : vector<8xf32>
    %88 = vector.multi_reduction <add>, %87, %cst_49 [1] : vector<8x32xf32> to vector<8xf32>
    %89 = vector.shape_cast %88 : vector<8xf32> to vector<8x1xf32>
    %cst_50 = arith.constant 3.200000e+01 : f32
    %90 = vector.broadcast %cst_50 : f32 to vector<8x1xf32>
    %91 = arith.divf %89, %90 : vector<8x1xf32>
    %92 = vector.broadcast %84 : vector<8x1xf32> to vector<8x32xf32>
    %93 = arith.subf %80, %92 : vector<8x32xf32>
    %cst_51 = arith.constant 9.99999974E-6 : f32
    %94 = vector.broadcast %cst_51 : f32 to vector<8x1xf32>
    %95 = arith.addf %91, %94 : vector<8x1xf32>
    %96 = math.rsqrt %95 : vector<8x1xf32>
    %97 = vector.broadcast %96 : vector<8x1xf32> to vector<8x32xf32>
    %98 = arith.mulf %93, %97 : vector<8x32xf32>
    %99 = vector.broadcast %3 : vector<1x32xf32> to vector<8x32xf32>
    %100 = arith.mulf %98, %99 : vector<8x32xf32>
    %101 = vector.broadcast %4 : vector<1x32xf32> to vector<8x32xf32>
    %102 = arith.addf %100, %101 : vector<8x32xf32>
    %103 = arith.truncf %102 : vector<8x32xf32> to vector<8x32xbf16>
    %c0_52 = arith.constant 0 : index
    %c0_53 = arith.constant 0 : index
    %104 = vector.load %arg9[%c0_52, %c0_53] : memref<32x64xbf16, #tpu.memory_space<vmem>>, vector<32x64xbf16>
    %cst_54 = arith.constant dense<0.000000e+00> : vector<8x64xf32>
    %105 = tpu.matmul %103, %104, %cst_54 {dimension_numbers = #tpu.dot_dimension_numbers<[1], [0], [0], [1], [0, 0, 1, 1], [], []>} : vector<8x32xbf16>, vector<32x64xbf16>, vector<8x64xf32> -> vector<8x64xf32>
    %c0_55 = arith.constant 0 : index
    %c0_56 = arith.constant 0 : index
    %106 = vector.load %arg12[%c0_55, %c0_56] : memref<1x64xf32, #tpu.memory_space<vmem>>, vector<1x64xf32>
    %107 = vector.broadcast %106 : vector<1x64xf32> to vector<8x64xf32>
    %108 = arith.addf %105, %107 : vector<8x64xf32>
    %cst_57 = arith.constant 5.000000e-01 : f32
    %109 = vector.broadcast %cst_57 : f32 to vector<8x64xf32>
    %110 = arith.mulf %109, %108 : vector<8x64xf32>
    %cst_58 = arith.constant 0.707106769 : f32
    %111 = vector.broadcast %cst_58 : f32 to vector<8x64xf32>
    %112 = arith.mulf %108, %111 : vector<8x64xf32>
    %113 = math.erf %112 : vector<8x64xf32>
    %cst_59 = arith.constant 1.000000e+00 : f32
    %114 = vector.broadcast %cst_59 : f32 to vector<8x64xf32>
    %115 = arith.addf %114, %113 : vector<8x64xf32>
    %116 = arith.mulf %110, %115 : vector<8x64xf32>
    %117 = arith.truncf %116 : vector<8x64xf32> to vector<8x64xbf16>
    %c0_60 = arith.constant 0 : index
    %c0_61 = arith.constant 0 : index
    %118 = vector.load %arg10[%c0_60, %c0_61] : memref<64x32xbf16, #tpu.memory_space<vmem>>, vector<64x32xbf16>
    %cst_62 = arith.constant dense<0.000000e+00> : vector<8x32xf32>
    %119 = tpu.matmul %117, %118, %cst_62 {dimension_numbers = #tpu.dot_dimension_numbers<[1], [0], [0], [1], [0, 0, 1, 1], [], []>} : vector<8x64xbf16>, vector<64x32xbf16>, vector<8x32xf32> -> vector<8x32xf32>
    %120 = vector.broadcast %7 : vector<1x32xf32> to vector<8x32xf32>
    %121 = arith.addf %119, %120 : vector<8x32xf32>
    %122 = arith.addf %102, %121 : vector<8x32xf32>
    %cst_63 = arith.constant dense<0.000000e+00> : vector<8xf32>
    %123 = vector.multi_reduction <add>, %122, %cst_63 [1] : vector<8x32xf32> to vector<8xf32>
    %124 = vector.shape_cast %123 : vector<8xf32> to vector<8x1xf32>
    %cst_64 = arith.constant 3.200000e+01 : f32
    %125 = vector.broadcast %cst_64 : f32 to vector<8x1xf32>
    %126 = arith.divf %124, %125 : vector<8x1xf32>
    %127 = vector.broadcast %126 : vector<8x1xf32> to vector<8x32xf32>
    %128 = arith.subf %122, %127 : vector<8x32xf32>
    %129 = arith.mulf %128, %128 : vector<8x32xf32>
    %cst_65 = arith.constant dense<0.000000e+00> : vector<8xf32>
    %130 = vector.multi_reduction <add>, %129, %cst_65 [1] : vector<8x32xf32> to vector<8xf32>
    %131 = vector.shape_cast %130 : vector<8xf32> to vector<8x1xf32>
    %cst_66 = arith.constant 3.200000e+01 : f32
    %132 = vector.broadcast %cst_66 : f32 to vector<8x1xf32>
    %133 = arith.divf %131, %132 : vector<8x1xf32>
    %134 = vector.broadcast %126 : vector<8x1xf32> to vector<8x32xf32>
    %135 = arith.subf %122, %134 : vector<8x32xf32>
    %cst_67 = arith.constant 9.99999974E-6 : f32
    %136 = vector.broadcast %cst_67 : f32 to vector<8x1xf32>
    %137 = arith.addf %133, %136 : vector<8x1xf32>
    %138 = math.rsqrt %137 : vector<8x1xf32>
    %139 = vector.broadcast %138 : vector<8x1xf32> to vector<8x32xf32>
    %140 = arith.mulf %135, %139 : vector<8x32xf32>
    %141 = vector.broadcast %5 : vector<1x32xf32> to vector<8x32xf32>
    %142 = arith.mulf %140, %141 : vector<8x32xf32>
    %143 = vector.broadcast %6 : vector<1x32xf32> to vector<8x32xf32>
    %144 = arith.addf %142, %143 : vector<8x32xf32>
    %c0_68 = arith.constant 0 : index
    %c0_69 = arith.constant 0 : index
    %c0_70 = arith.constant 0 : index
    %145 = vector.load %arg13[%c0_68, %c0_69, %c0_70] : memref<1x8x32xf32, #tpu.memory_space<vmem>>, vector<1x8x32xf32>
    %146 = vector.shape_cast %145 : vector<1x8x32xf32> to vector<8x32xf32>
    %147 = vector.shape_cast %144 : vector<8x32xf32> to vector<1x8x32xf32>
    tpu.vector_store %arg13[%c0_68, %c0_69, %c0_70], %147 {strides = array<i32>} : memref<1x8x32xf32, #tpu.memory_space<vmem>>, vector<1x8x32xf32>,
    return
  }
  func.func @transform_0(%arg0: i32, %arg1: i32) -> (i32, i32, i32) {
    %c0_i32 = arith.constant 0 : i32
    %c0_i32_0 = arith.constant 0 : i32
    return %arg0, %arg1, %c0_i32 : i32, i32, i32
  }
  func.func @transform_1(%arg0: i32, %arg1: i32) -> (i32, i32, i32) {
    %c0_i32 = arith.constant 0 : i32
    %c0_i32_0 = arith.constant 0 : i32
    return %arg0, %arg1, %c0_i32 : i32, i32, i32
  }
  func.func @transform_2(%arg0: i32, %arg1: i32) -> (i32, i32, i32, i32) {
    %c0_i32 = arith.constant 0 : i32
    %c0_i32_0 = arith.constant 0 : i32
    %c0_i32_1 = arith.constant 0 : i32
    return %arg0, %c0_i32, %arg1, %c0_i32_0 : i32, i32, i32, i32
  }
  func.func @transform_3(%arg0: i32, %arg1: i32) -> (i32, i32, i32, i32) {
    %c0_i32 = arith.constant 0 : i32
    %c0_i32_0 = arith.constant 0 : i32
    %c0_i32_1 = arith.constant 0 : i32
    %c0_i32_2 = arith.constant 0 : i32
    return %arg0, %c0_i32, %c0_i32_0, %c0_i32_1 : i32, i32, i32, i32
  }
  func.func @transform_4(%arg0: i32, %arg1: i32) -> (i32, i32, i32, i32) {
    %c0_i32 = arith.constant 0 : i32
    %c0_i32_0 = arith.constant 0 : i32
    %c0_i32_1 = arith.constant 0 : i32
    %c0_i32_2 = arith.constant 0 : i32
    return %arg0, %c0_i32, %c0_i32_0, %c0_i32_1 : i32, i32, i32, i32
  }
  func.func @transform_5(%arg0: i32, %arg1: i32) -> (i32, i32) {
    %c0_i32 = arith.constant 0 : i32
    %c0_i32_0 = arith.constant 0 : i32
    %c0_i32_1 = arith.constant 0 : i32
    return %c0_i32, %c0_i32_0 : i32, i32
  }
  func.func @transform_6(%arg0: i32, %arg1: i32) -> (i32, i32) {
    %c0_i32 = arith.constant 0 : i32
    %c0_i32_0 = arith.constant 0 : i32
    %c0_i32_1 = arith.constant 0 : i32
    return %c0_i32, %c0_i32_0 : i32, i32
  }
  func.func @transform_7(%arg0: i32, %arg1: i32) -> (i32, i32) {
    %c0_i32 = arith.constant 0 : i32
    %c0_i32_0 = arith.constant 0 : i32
    %c0_i32_1 = arith.constant 0 : i32
    return %c0_i32, %c0_i32_0 : i32, i32
  }
  func.func @transform_8(%arg0: i32, %arg1: i32) -> (i32, i32) {
    %c0_i32 = arith.constant 0 : i32
    %c0_i32_0 = arith.constant 0 : i32
    %c0_i32_1 = arith.constant 0 : i32
    return %c0_i32, %c0_i32_0 : i32, i32
  }
  func.func @transform_9(%arg0: i32, %arg1: i32) -> (i32, i32) {
    %c0_i32 = arith.constant 0 : i32
    %c0_i32_0 = arith.constant 0 : i32
    %c0_i32_1 = arith.constant 0 : i32
    return %c0_i32, %c0_i32_0 : i32, i32
  }
  func.func @transform_10(%arg0: i32, %arg1: i32) -> (i32, i32) {
    %c0_i32 = arith.constant 0 : i32
    %c0_i32_0 = arith.constant 0 : i32
    %c0_i32_1 = arith.constant 0 : i32
    return %c0_i32, %c0_i32_0 : i32, i32
  }
  func.func @transform_11(%arg0: i32, %arg1: i32) -> (i32, i32, i32) {
    %c0_i32 = arith.constant 0 : i32
    %c0_i32_0 = arith.constant 0 : i32
    return %arg0, %arg1, %c0_i32 : i32, i32, i32
  }
}

</mosaic_0001>

<bundles_post_ra>
// kernel: tpu_custom_call.1
= control target key start
LH: loop header
LB: loop body
LE: loop exit
PB: predicated region body
PF: predicated region fallthrough
CT: control target
= control target key end

     0   :  { %s2699_s0 = inlined_call_operand.vmem [shape: f32[2,8,32], index: 0, kind: input, shape index: {}]   ;;  %s2700_s1 = inlined_call_operand.hbm [shape: f32[2,8,32], index: 1, kind: input, shape index: {}]   ;;  %s2701_s2 = inlined_call_operand.vmem [shape: bf16[2,1,8,8], index: 2, kind: input, shape index: {}]   ;;  %s2702_s3 = inlined_call_operand.vmem [shape: bf16[2,4,8,8], index: 3, kind: input, shape index: {}]   ;;  %s2703_s4 = inlined_call_operand.hbm [shape: bf16[2,4,8,8], index: 4, kind: input, shape index: {}]   ;;  %s2704_s5 = inlined_call_operand.hbm [shape: bf16[32,32], index: 5, kind: input, shape index: {}]   ;;  %s2705_s6 = inlined_call_operand.hbm [shape: bf16[32,32], index: 6, kind: input, shape index: {}]   ;;  %s2706_s7 = inlined_call_operand.hbm [shape: bf16[32,64], index: 7, kind: input, shape index: {}]   ;;  %s2707_s8 = inlined_call_operand.vmem [shape: bf16[64,32], index: 8, kind: input, shape index: {}]   ;;  %s2708_s9 = inlined_call_operand.vmem [shape: f32[7,32], index: 9, kind: input, shape index: {}]   ;;  %s2709_s10 = inlined_call_operand.vmem [shape: f32[1,64], index: 10, kind: input, shape index: {}]   ;;  %s2710_s11 = inlined_call_operand.hbm [shape: f32[2,8,32], index: 11, kind: output, shape index: {}]  }
   0x1   :  { %2720 = sst [smem:[#allocation21_spill]] %s2700_s1 }
   0x2   :  { %2721 = sst [smem:[#allocation22_spill]] %s2701_s2 }
   0x3   :  { %2722 = sst [smem:[#allocation23_spill]] %s2704_s5 }
   0x4   :  { %2723 = sst [smem:[#allocation24_spill]] %s2707_s8 }
   0x5   :  { %2724 = sst [smem:[#allocation25_spill]] %s2708_s9 }
   0x6   :  { %2725 = sst [smem:[#allocation26_spill]] %s2709_s10 }
   0x7   :  { %2726 = sst [smem:[#allocation27_spill]] %s2710_s11 }
   0x8   :  { %16 = vsyncpa [#allocation5], 0 }
   0x9   :  { %18 = vsyncpa [#allocation5 + $0x1], 0 }
   0xa   :  { %19 = vsyncpa [#allocation8], 0 }
   0xb   :  { %21 = vsyncpa [#allocation8 + $0x1], 0 }
   0xc   :  { %22 = vsyncpa [#allocation11], 0 }
   0xd   :  { %23 = vsyncpa [#allocation6], 0 }
   0xe   :  { %25 = vsyncpa [#allocation6 + $0x1], 0  ;;  %s2215_s17 = smov 0   ;;  %s2217_s18 = smov 0  }
   0xf   :  { %s2219_s19 = smov 0   ;;  %s2221_s20 = smov 0  }
  0x10   :  { %s2223_s21 = smov 0   ;;  %s2225_s22 = smov 0  }
  0x11 LB: > { %2727 = sst [smem:[#allocation19_spill]] %s2117_s17  ;;  %s2246_s23 = sadd.s32 4294967295, %s2137_s22   ;;  %s2137_s22 = sphi %s2225_s22, %s31_s22   ;;  %s2133_s21 = sphi %s2223_s21, %s2761_s21   ;;  %s2129_s20 = sphi %s2221_s20, %s2760_s20   ;;  %s2125_s19 = sphi %s2219_s19, %s2759_s19   ;;  %s2121_s18 = sphi %s2217_s18, %s2758_s18   ;;  %s2117_s17 = sphi %s2215_s17, %s2757_s17  }
  0x12   : > { %s1586_s24 = sadd.s32 4294967294, %s2137_s22   ;;  %p93_p0 = scmp.ne.s32.totalorder %s2121_s18, %s2117_s17 }
  0x13   : > { %p2714_p1 = scmp.eq.s32.totalorder %s2246_s23, 0  ;;  %p331_p3 = scmp.eq.s32.totalorder %s1586_s24, 1 }
  0x14   : > { %p1587_p5 = scmp.ge.s32.totalorder %s2137_s22, 1  ;;  %p338_p7 = scmp.lt.s32.totalorder %s2137_s22, 3 }
  0x15   : > { %p2255_p4 = por %p2714_p1, %p93_p0  ;;  %p2260_p6 = por %p331_p3, %p93_p0 }
  0x16   : > { %p2265_p8 = pnand %p1587_p5, %p338_p7  ;;  %s2139_s28 = smov [#allocation9]  }
  0x17   : > { %s2728_s25 = scalar_select %p2255_p4, 1, 0 }
  0x18   : > { %s2729_s26 = scalar_select %p2260_p6, 1, 0 }
  0x19   : > { %s2731_s27 = scalar_select %p2265_p8, 1, 0 }
  0x1a   : > { %2730 = sst [smem:[#allocation20_spill]] %s2729_s26  ;;  %s350_s29 = sshll.u32 %s2139_s28, 4  ;;  %s2269_s29 = int_to_ptr.vmem [resolvable:$true] %s350_s29 }
  0x1b   : > { %p1777_p9 = pneg %p2265_p8  ;;  %s2140_s12 = smov [#allocation10]  }
  0x1c   : > { %s363_s13 = sshll.u32 %s2140_s12, 4  ;;  %s2141_s14 = smov [#allocation12]   ;;  %s2280_s13 = int_to_ptr.vmem [resolvable:$true] %s363_s13 }
  0x1d   : > { %p2276_p11 = pnand %p1777_p9, %p2714_p1  ;;  %s2282_s15 = sshll.u32 %s2141_s14, 4  ;;  %s377_s15 = int_to_ptr.vmem [resolvable:$true] %s2282_s15 }
  0x1e   : > { %s2733_s5 = sld [smem:[#allocation23_spill]] }
  0x1f   : > { %p2292_p13 = pneg %p2276_p11 }
  0x24   : > { %s1899_s28 = scalar_lea.hbm %s2733_s5, 256 }
  0x25   : > { %p1900_p12 = scmp.ne.s32.totalorder %s2733_s5, %s1899_s28  ;;  %p1906_p5 = scmp.lt.u32.totalorder %s1899_s28, %s2733_s5 }
  0x27   : > { %p1902_p0 = pnand %p2292_p13, %p1900_p12 }
  0x29   : > { %p1903_p3 = pneg %p1902_p0 }
  0x2b   : > { %p1908_p7 = pnand %p1906_p5, %p1903_p3 }
  0x2d   : > { %1911 = shalt.err (!%p1908_p7)
}
  0x2e   : > { %s1912_s17 = scalar_lea.vmem %s2269_s29, 256  ;;  %p1920_p2 = scmp.lt.s32.totalorder %s2269_s29, %s2269_s29 }
  0x2f   : > { %p1913_p9 = scmp.ne.s32.totalorder %s2269_s29, %s1912_s17  ;;  %p1921_p6 = scmp.lt.s32.totalorder %s1912_s17, %s1912_s17 }
  0x31   : > { %p1915_p10 = pnand %p1913_p9, %p2292_p13  ;;  %p1922_p12 = por %p1921_p6, %p1920_p2 }
  0x33   : > { %p1916_p1 = pneg %p1915_p10 }
  0x35   : > { %p1923_p0 = pnand %p1922_p12, %p1916_p1 }
  0x37   : > { %1926 = shalt.err (!%p1923_p0)
}
  0x38   : > { %s2718_s26 = smov 64   ;;  %s2719_s16 = smov 4  }
  0x39   : > { %1780 = dma.hbm_to_vmem [thread:$0]  (!%p2276_p11), %s2733_s5, 256, %s2269_s29, [#allocation8], %s2718_s26, %s2718_s26, %s2719_s16  }
  0x3a   : > { %s1927_s17 = scalar_lea.hbm %s2705_s6, 256 }
  0x3b   : > { %p1928_p1 = scmp.ne.s32.totalorder %s2705_s6, %s1927_s17  ;;  %p1934_p10 = scmp.lt.u32.totalorder %s1927_s17, %s2705_s6 }
  0x3d   : > { %p1930_p2 = pnand %p1928_p1, %p2292_p13 }
  0x3f   : > { %p1931_p6 = pneg %p1930_p2 }
  0x41   : > { %p1936_p3 = pnand %p1934_p10, %p1931_p6 }
  0x43   : > { %1939 = shalt.err (!%p1936_p3)
}
  0x44   : > { %s1940_s29 = scalar_lea.vmem %s2280_s13, 256  ;;  %p1948_p12 = scmp.lt.s32.totalorder %s2280_s13, %s2280_s13 }
  0x45   : > { %p1941_p5 = scmp.ne.s32.totalorder %s2280_s13, %s1940_s29  ;;  %p1949_p0 = scmp.lt.s32.totalorder %s1940_s29, %s1940_s29 }
  0x47   : > { %p1943_p7 = pnand %p1941_p5, %p2292_p13  ;;  %p1950_p1 = por %p1949_p0, %p1948_p12 }
  0x49   : > { %p1944_p9 = pneg %p1943_p7 }
  0x4b   : > { %p1951_p2 = pnand %p1950_p1, %p1944_p9 }
  0x4d   : > { %1954 = shalt.err (!%p1951_p2)
}
  0x4e   : > { %1783 = dma.hbm_to_vmem [thread:$0]  (!%p2276_p11), %s2705_s6, 256, %s2280_s13, [#allocation11], %s2718_s26, %s2718_s26, %s2719_s16  }
  0x4f   : > { %s1955_s24 = scalar_lea.hbm %s2706_s7, 256 }
  0x50   : > { %p1956_p6 = scmp.ne.s32.totalorder %s2706_s7, %s1955_s24  ;;  %p1962_p5 = scmp.lt.u32.totalorder %s1955_s24, %s2706_s7 }
  0x52   : > { %p1958_p10 = pnand %p1956_p6, %p2292_p13 }
  0x54   : > { %p1959_p3 = pneg %p1958_p10 }
  0x56   : > { %p1964_p7 = pnand %p1962_p5, %p1959_p3 }
  0x58   : > { %1967 = shalt.err (!%p1964_p7)
}
  0x59   : > { %s1968_s29 = scalar_lea.vmem %s377_s15, 256  ;;  %p1976_p1 = scmp.lt.s32.totalorder %s377_s15, %s377_s15 }
  0x5a   : > { %p1969_p9 = scmp.ne.s32.totalorder %s377_s15, %s1968_s29  ;;  %p1977_p2 = scmp.lt.s32.totalorder %s1968_s29, %s1968_s29 }
  0x5c   : > { %p1971_p12 = pnand %p1969_p9, %p2292_p13  ;;  %p1978_p4 = por %p1977_p2, %p1976_p1 }
  0x5e   : > { %p1972_p0 = pneg %p1971_p12 }
  0x60   : > { %p1979_p8 = pnand %p1978_p4, %p1972_p0 }
  0x62   : > { %1982 = shalt.err (!%p1979_p8)
}
  0x63   : > { %1786 = dma.hbm_to_vmem [thread:$0]  (!%p2276_p11), %s2706_s7, 256, %s377_s15, [#allocation11], %s2718_s26, %s2718_s26, %s2719_s16  }
  0x64   : > { %s80_s11 = sadd.s32 1, %s2125_s19  ;;  %s43_s30 = sadd.s32 1, %s2133_s21 }
  0x65   : > { %p87_p4 = scmp.ne.s32.totalorder %s2125_s19, %s2121_s18  ;;  %p45_p8 = scmp.ge.s32.totalorder %s43_s30, 2 }
  0x66   : > { %p88_p13 = scmp.eq.s32.totalorder %s2137_s22, 0  ;;  %p2735_p6 = scmp.eq.s32.totalorder %s2246_s23, 1 }
  0x67   : > { %p1801_p3 = scmp.lt.s32.totalorder %s2137_s22, 2  ;;  %s2763_s30 = smov (%p45_p8, %s43_s30), 0 }
  0x68   : > { %p2371_p10 = por %p2735_p6, %p87_p4  ;;  %p89_p5 = por %p88_p13, %p87_p4 }
  0x69   : > { %s2379_s9 = sand.u32 1, %s2125_s19   ;;  %s75_s15 = ssub.s32 %s2133_s21, %s2763_s30 }
  0x6a   : > { %p78_p11 = scmp.eq.s32.totalorder %s75_s15, 0  ;;  %s1592_s10 = sshll.u32 %s2379_s9, 3 }
  0x6b   : > { %s1593_s24 = sshll.u32 %s2133_s21, 7  ;;  %s2737_s1 = sld [smem:[#allocation21_spill]] }
  0x6c   : > { %s2386_s28 = scalar_select %p78_p11, %s2125_s19, %s80_s11  }
  0x6d   : > { %s413_s29 = scalar_lea.vmem [#allocation4], %s1592_s10  ;;  %p2397_p7 = pnand %p1801_p3, %p89_p5 }
  0x6e   : > { %s421_s13 = sshll.u32 %s413_s29, 4  ;;  %s1594_s11 = sshll.u32 %s2379_s9, 4  ;;  %s2393_s13 = int_to_ptr.vmem [resolvable:$true] %s421_s13 }
  0x6f   : > { %s410_s12 = scalar_lea.sflag [#allocation5], %s2379_s9  ;;  %p1985_p12 = pneg %p2397_p7 }
  0x71   : > { %s2391_s17 = scalar_lea.hbm %s2737_s1, %s1593_s24  ;;  %s1988_s29 = scalar_lea.hbm %s2737_s1, 256 }
  0x72   : > { %s1983_s24 = scalar_lea.hbm %s2391_s17, 128  ;;  %p1989_p2 = scmp.lt.u32.totalorder %s2391_s17, %s2737_s1 }
  0x73   : > { %p1984_p9 = scmp.ne.s32.totalorder %s2391_s17, %s1983_s24  ;;  %p1990_p4 = scmp.lt.u32.totalorder %s1988_s29, %s1983_s24 }
  0x74   : > { %p1992_p13 = scmp.lt.u32.totalorder %s1983_s24, %s2391_s17 }
  0x75   : > { %p1986_p0 = pnand %p1985_p12, %p1984_p9  ;;  %p1991_p8 = por %p1990_p4, %p1989_p2 }
  0x77   : > { %p1987_p1 = pneg %p1986_p0  ;;  %p1993_p6 = por %p1992_p13, %p1991_p8 }
  0x79   : > { %p1994_p3 = pnand %p1993_p6, %p1987_p1 }
  0x7b   : > { %1997 = shalt.err (!%p1994_p3)
}
  0x7c   : > { %s1998_s15 = scalar_lea.vmem %s2393_s13, 128  ;;  %s2144_s10 = smov [#allocation4]  }
  0x7d   : > { %p1999_p5 = scmp.ne.s32.totalorder %s2393_s13, %s1998_s15  ;;  %s2003_s14 = sshll.u32 %s2144_s10, 4  ;;  %s2004_s14 = int_to_ptr.vmem [resolvable:$false] %s2003_s14 }
  0x7e   : > { %s2005_s26 = scalar_lea.vmem %s2004_s14, 256  ;;  %p2006_p0 = scmp.lt.s32.totalorder %s2393_s13, %s2004_s14 }
  0x7f   : > { %p2001_p11 = pnand %p1999_p5, %p1985_p12  ;;  %p2007_p2 = scmp.lt.s32.totalorder %s2005_s26, %s1998_s15 }
  0x81   : > { %p2002_p9 = pneg %p2001_p11  ;;  %p2008_p4 = por %p2007_p2, %p2006_p0 }
  0x83   : > { %p2009_p8 = pnand %p2008_p4, %p2002_p9 }
  0x85   : > { %2012 = shalt.err (!%p2009_p8)
}
  0x86   : > { %1790 = dma.hbm_to_vmem [thread:$0]  (!%p2397_p7), %s2391_s17, 128, %s2393_s13, %s410_s12  }
  0x87   : > { %s450_s16 = scalar_lea.vmem [#allocation7], %s1594_s11  ;;  %s446_s29 = sand.u32 1, %s2137_s22  }
  0x88   : > { %s457_s24 = sshll.u32 %s450_s16, 4  ;;  %s2739_s10 = sshll.u32 %s2133_s21, 8  ;;  %s2432_s24 = int_to_ptr.vmem [resolvable:$true] %s457_s24 }
  0x89   : > { %s2439_s26 = scalar_lea.hbm %s2703_s4, %s2739_s10  ;;  %s2441_s1 = scalar_lea.sflag [#allocation8], %s446_s29 }
  0x8a   : > { %s2013_s5 = scalar_lea.hbm %s2439_s26, 256  ;;  %s2018_s13 = scalar_lea.hbm %s2703_s4, 512 }
  0x8b   : > { %p2014_p1 = scmp.ne.s32.totalorder %s2439_s26, %s2013_s5  ;;  %p2019_p3 = scmp.lt.u32.totalorder %s2439_s26, %s2703_s4 }
  0x8c   : > { %p2020_p5 = scmp.lt.u32.totalorder %s2018_s13, %s2013_s5  ;;  %p2022_p9 = scmp.lt.u32.totalorder %s2013_s5, %s2439_s26 }
  0x8d   : > { %p2016_p13 = pnand %p2014_p1, %p1985_p12 }
  0x8e   : > { %p2021_p11 = por %p2020_p5, %p2019_p3 }
  0x8f   : > { %p2017_p6 = pneg %p2016_p13 }
  0x90   : > { %p2023_p0 = por %p2022_p9, %p2021_p11 }
  0x92   : > { %p2024_p2 = pnand %p2023_p0, %p2017_p6 }
  0x94   : > { %2027 = shalt.err (!%p2024_p2)
}
  0x95   : > { %s2028_s16 = scalar_lea.vmem %s2432_s24, 256  ;;  %s2145_s29 = smov [#allocation7]  }
  0x96   : > { %p2029_p4 = scmp.ne.s32.totalorder %s2432_s24, %s2028_s16  ;;  %s2033_s10 = sshll.u32 %s2145_s29, 4  ;;  %s2034_s10 = int_to_ptr.vmem [resolvable:$false] %s2033_s10 }
  0x97   : > { %s2035_s15 = scalar_lea.vmem %s2034_s10, 512  ;;  %p2036_p13 = scmp.lt.s32.totalorder %s2432_s24, %s2034_s10 }
  0x98   : > { %p2031_p8 = pnand %p2029_p4, %p1985_p12  ;;  %p2037_p3 = scmp.lt.s32.totalorder %s2035_s15, %s2028_s16 }
  0x9a   : > { %p2032_p1 = pneg %p2031_p8  ;;  %p2038_p5 = por %p2037_p3, %p2036_p13 }
  0x9c   : > { %p2039_p11 = pnand %p2038_p5, %p2032_p1 }
  0x9e   : > { %2042 = shalt.err (!%p2039_p11)
}
  0x9f   : > { %s2740_s5 = smov 4   ;;  %s2741_s14 = smov 64  }
  0xa0   : > { %1793 = dma.hbm_to_vmem [thread:$0]  (!%p2397_p7), %s2439_s26, 256, %s2432_s24, %s2441_s1, %s2741_s14, %s2741_s14, %s2740_s5  }
  0xa1   : > { %p2742_p12 = scmp.ne.s32.totalorder %s2731_s27, 0 }
  0xa2   : > { %s2473_s9 = sand.u32 (!%p2742_p12), 1, %s2121_s18   ;;  %p2743_p6 = scmp.ne.s32.totalorder (!%p2742_p12), %s2728_s25, 0 }
  0xa3   : > { %469 = sbr.rel (%p2742_p12) target bundleno = 2720 (0xaa0), region = 64  ;;  %s1598_s17 = sshll.u32 (!%p2742_p12), %s2473_s9, 3 }
  0xa4   : > { %s472_s13 = scalar_lea.sflag (!%p2742_p12), [#allocation5], %s2473_s9  ;;  %s475_s2 = scalar_lea.vmem (!%p2742_p12), [#allocation4], %s1598_s17 }
  0xaa   : > { %2096 = dma.done.wait (%p2743_p6), %s472_s13, 128  }
  0xab   : > { %2098 = vsyncadd (%p2743_p6), %s472_s13, 4294967168  ;;  %s480_s1 = sand.u32 1, %s2246_s23   ;;  %s1599_s27 = sshll.u32 %s2473_s9, 4 }
  0xac   : > { %s481_s24 = scalar_lea.sflag [#allocation8], %s480_s1  ;;  %s2485_s26 = scalar_lea.vmem [#allocation7], %s1599_s27 }
  0xad   : > { %2100 = dma.done.wait (%p2743_p6), %s481_s24, 256  }
  0xae   : > { %2102 = vsyncadd (%p2743_p6), %s481_s24, 4294967040  ;;  %p2744_p7 = scmp.eq.s32.totalorder %s2246_s23, 0 }
  0xb0   : > { %2104 = dma.done.wait (%p2744_p7), [#allocation8], 256   ;;  %p2745_p9 = pmov %p2744_p7 }
  0xb1   : > { %p2746_p0 = pmov %p2744_p7 }
  0xb2   : > { %2106 = vsyncadd (%p2745_p9), [#allocation8], 4294967040 }
  0xb3   : > { %2108 = dma.done.wait (%p2746_p0), [#allocation11], 512   ;;  %p2747_p2 = pmov %p2746_p0 }
  0xb4   : > { %p559_p4 = scmp.lt.s32.totalorder %s2129_s20, 1  ;;  %v2146_v0 = vmov 0.0   ;;  %vm2147_vm0 = vmmov 0   ;;  %v1867_v1 = vld [vmem:[#allocation9] sm:$0xff]   ;;  %v1868_v2 = vld [vmem:[#allocation9 + $0x8] sm:$0xff]   ;;  %v581_v4 = vld [vmem:[%s475_s2] sm:$0xff]  ;;  %v588_v9 = vlaneseq }
  0xb5   : > { %2110 = vsyncadd (%p2747_p2), [#allocation11], 4294966784  ;;  %1675 = vmatprep.subr.bf16.mxu0 %v2146_v0  ;;  %1679 = vmatprep.mubr.msk.bf16.mxu0 %vm2147_vm0, %v2146_v0  ;;  %vm604_vm1 = vcmask 261120   ;;  %vm683_vm2 = vcmask 1043456   ;;  %s2748_s2 = sld [smem:[#allocation25_spill]]  ;;  %vm649_vm3 = vcmask 60416  }
  0xb6   : > { %s2504_s25 = scalar_select %p559_p4, %s2129_s20, 1  ;;  %1683 = vmatprep.subr.bf16.mxu1 %v2146_v0  ;;  %1685 = vmatprep.mubr.msk.bf16.mxu1 %vm2147_vm0, %v2146_v0  ;;  %v2530_v10 = vshrl.u32 %v588_v9, 7  ;;  %vm679_vm4 = vcmask 64512   ;;  %vm1110_vm5 = vcmask 126016   ;;  %vm1119_vm6 = vcmask 191616  }
  0xb7   : > { %1676 = vmatpush3.bf16.msra.mxu0 %v1867_v1  ;;  %s2148_s1 = smov 104   ;;  %s2149_s27 = smov 120   ;;  %v913_v1 = vld [vmem:[%s2485_s26] sm:$0xf]  ;;  %vm1128_vm7 = vcmask 257216   ;;  %vm1328_vm8 = vcmask 523264  }
  0xb8   : > { %s1604_s23 = sshll.u32 %s2504_s25, 3  ;;  %1677 = vmatprep.subr.bf16.mxu0 %v2146_v0  ;;  %s1640_s29 = sshll.u32 %s2504_s25, 4  ;;  %v590_v11 = vsub.s32 0, %v2530_v10 }
  0xb9   : > { %s565_s16 = scalar_lea.vmem %s2699_s0, %s1604_s23  ;;  %s2525_s5 = scalar_lea.vmem %s2702_s3, %s1640_s29 }
  0xba   : > { %v2513_v3 = vld [vmem:[%s565_s16] sm:$0xff]  ;;  %s2150_s24 = smov 112   ;;  %v675_v26 = vld [vmem:[%s2525_s5 + $0x8] sm:$0xf]  ;;  %v676_v29 = vld [vmem:[%s2525_s5 + $0xc] sm:$0xf] }
  0xbb   : > { %v582_v5 = vadd.f32 %v581_v4, %v2513_v3  ;;  %1678 = vmatpush3.bf16.msra.mxu0 %v1868_v2  ;;  %v673_v7 = vld [vmem:[%s2525_s5] sm:$0xf]  ;;  %v674_v20 = vld [vmem:[%s2525_s5 + $0x4] sm:$0xf]  ;;  %v777_v27 = vsel %vm683_vm2, %v675_v26, 0  ;;  %v823_v30 = vsel %vm683_vm2, %v676_v29, 0 }
  0xbc   : > { %1707 = vmatprep.subr.bf16.mxu0 %v2146_v0  ;;  %v685_v8 = vsel %vm683_vm2, %v673_v7, 0  ;;  %v2536_v12 = vld [vmem:[%s2748_s2] sm:$0x7f]  ;;  %v731_v21 = vsel %vm683_vm2, %v674_v20, 0  ;;  %s1605_s23 = sshll.u32 %s2504_s25, 2  ;;  %s2749_s16 = sld [smem:[#allocation22_spill]] }
  0xbd   : > { %v583_v6 = vpack.c.bf16 %v582_v5, %v582_v5  ;;  %1684 = vmatpush3.bf16.msra.mxu1 %v685_v8  ;;  %v591_v13 = vrot.slane %v2536_v12, %v590_v11  ;;  %v921_v2 = vsel %vm683_vm2, %v913_v1, 0  ;;  %s2152_s25 = smov 16   ;;  %s2153_s10 = smov 24  }
  0xbe   : > { %1689 = vmatprep.subr.bf16.mxu1 %v2146_v0  ;;  %s2750_s14 = sld [smem:[#allocation24_spill]]  ;;  %s2752_s5 = sld [smem:[#allocation27_spill]] }
  0xbf   : > { %1680 = vmatmul.mubr.msk.bf16.vlgmr.msra.gmra.mrb[0].mxu0 %vm604_vm1, %v583_v6  ;;  %s1398_s2 = scalar_lea.sflag [#allocation6], %s2473_s9 }
  0xc0   : > { %1709 = vmatprep.mubr.msk.bf16.mxu0 %vm2147_vm0, %v2146_v0  ;;  %1708 = vmatpush3.bf16.msra.mxu0 %v921_v2 }
  0xc1   : > { %1719 = vmatprep.subr.bf16.mxu0 %v2146_v0 }
  0xc2   : > { %s572_s29 = scalar_lea.vmem %s2749_s16, %s1605_s23  ;;  %s2751_s16 = sld [smem:[#allocation26_spill]] }
  0xc3   : > { %v677_v33 = vld [vmem:[%s572_s29] sm:$0xf]  ;;  %s1636_s29 = sshll.u32 %s2129_s20, 7  ;;  %s2154_s20 = smov [#allocation13]  }
  0xc4   : > { %v678_v34 = vunpack.c.l.bf16 %v677_v33  ;;  %s2649_s13 = scalar_lea.hbm %s2752_s5, %s1636_s29 }
 0x192   : > { %v642_v14 = vpop.f32.mrb[0].mxu0 }
 0x193   : > { %v643_v15 = vadd.f32 %v642_v14, %v591_v13  ;;  %v1681_v16 = vpop.f32.mrb[1].mxu0 }
 0x194   : > { %v645_v17 = vpop.f32.mrb[2].mxu0 }
 0x195   : > { %v648_v18 = vpack.c.bf16 %v643_v15, %v643_v15  ;;  %v1682_v19 = vpop.f32.mrb[3].mxu0 }
 0x197   : > { %650 = vst.msk [vmem:[#allocation2] sm:$0xf] %vm649_vm3, %v648_v18  ;;  %664 = vrot.lane.b32.xlu1 %v648_v18, %s2148_s1  ;;  %654 = vrot.lane.b32.xlu0 %v648_v18, %s2149_s27 }
 0x19b   : > { %659 = vrot.lane.b32.xlu0 %v648_v18, %s2150_s24 }
 0x19e   : > { %v669_v22 = vld [vmem:[#allocation2] sm:$0xf] }
 0x19f   : > { %1686 = vmatmul.mubr.msk.bf16.vlgmr.msra.gmra.mrb[0].mxu1 %vm679_vm4, %v669_v22 }
 0x1a0   : > { %1690 = vmatpush3.bf16.msra.mxu1 %v731_v21  ;;  %1691 = vmatprep.mubr.msk.bf16.mxu1 %vm2147_vm0, %v2146_v0  ;;  %v914_v21 = vld [vmem:[%s2485_s26 + $0x4] sm:$0xf] }
 0x1a1   : > { %1695 = vmatprep.subr.bf16.mxu1 %v2146_v0  ;;  %v967_v22 = vsel %vm683_vm2, %v914_v21, 0 }
 0x209   : > { %v665_v23 = vpop.permute.xlu1 %664  ;;  %v655_v24 = vpop.permute.xlu0 %654 }
 0x20a   : > { %668 = vst.msk [vmem:[#allocation2 + $0xc] sm:$0xf] %vm649_vm3, %v665_v23  ;;  %658 = vst.msk [vmem:[#allocation2 + $0x4] sm:$0xf] %vm649_vm3, %v655_v24 }
 0x20d   : > { %v660_v25 = vpop.permute.xlu0 %659 }
 0x20e   : > { %663 = vst.msk [vmem:[#allocation2 + $0x8] sm:$0xf] %vm649_vm3, %v660_v25  ;;  %v915_v25 = vld [vmem:[%s2485_s26 + $0x8] sm:$0xf] }
 0x211   : > { %v670_v28 = vld [vmem:[#allocation2 + $0x4] sm:$0xf]  ;;  %v672_v32 = vld [vmem:[#allocation2 + $0xc] sm:$0xf] }
 0x212   : > { %1692 = vmatmul.mubr.msk.bf16.vlgmr.msra.gmra.mrb[4].mxu1 %vm679_vm4, %v670_v28  ;;  %v1013_v28 = vsel %vm683_vm2, %v915_v25, 0 }
 0x213   : > { %1696 = vmatpush3.bf16.msra.mxu1 %v777_v27  ;;  %1697 = vmatprep.mubr.msk.bf16.mxu1 %vm2147_vm0, %v2146_v0 }
 0x214   : > { %1701 = vmatprep.subr.bf16.mxu1 %v2146_v0 }
 0x215   : > { %v671_v31 = vld [vmem:[#allocation2 + $0x8] sm:$0xf] }
 0x21a   : > { %1698 = vmatmul.mubr.msk.bf16.vlgmr.msra.gmra.mrb[8].mxu1 %vm679_vm4, %v671_v31 }
 0x21b   : > { %1702 = vmatpush3.bf16.msra.mxu1 %v823_v30  ;;  %1703 = vmatprep.mubr.msk.bf16.mxu1 %vm2147_vm0, %v2146_v0 }
 0x21c   : > { %1713 = vmatprep.subr.bf16.mxu1 %v2146_v0 }
 0x222   : > { %1704 = vmatmul.mubr.msk.bf16.vlgmr.msra.gmra.mrb[12].mxu1 %vm679_vm4, %v672_v32  ;;  %v916_v32 = vld [vmem:[%s2485_s26 + $0xc] sm:$0xf]  ;;  %s2151_s26 = smov 8  }
 0x223   : > { %1715 = vmatprep.mubr.msk.bf16.mxu1 %vm2147_vm0, %v2146_v0  ;;  %1714 = vmatpush3.bf16.msra.mxu1 %v967_v22 }
 0x224   : > { %1725 = vmatprep.subr.bf16.mxu1 %v2146_v0 }
 0x272   : > { %v721_v35 = vpop.f32.mrb[0].mxu1 }
 0x273   : > { %v722_v36 = vadd.f32 %v721_v35, %v678_v34  ;;  %v1687_v37 = vpop.f32.mrb[1].mxu1  ;;  %v1059_v35 = vsel %vm683_vm2, %v916_v32, 0 }
 0x274   : > { %v724_v38 = vpop.f32.mrb[2].mxu1 }
 0x275   : > { %v1688_v39 = vpop.f32.mrb[3].mxu1  ;;  %v865_v40 = vsel %vm679_vm4, %v722_v36, -inf }
 0x276   : > { %866 = vmax.xlane.f32.xlu1 %v865_v40 }
 0x2e5   : > { %v767_v41 = vpop.f32.mrb[4].mxu1 }
 0x2e6   : > { %v768_v42 = vadd.f32 %v767_v41, %v678_v34  ;;  %v1693_v43 = vpop.f32.mrb[5].mxu1 }
 0x2e7   : > { %v770_v44 = vpop.f32.mrb[6].mxu1 }
 0x2e8   : > { %v1694_v45 = vpop.f32.mrb[7].mxu1  ;;  %v868_v46 = vsel %vm679_vm4, %v768_v42, -inf }
 0x2e9   : > { %869 = vmax.xlane.f32.xlu0 %v868_v46 }
 0x2ed   : > { %v813_v47 = vpop.f32.mrb[8].mxu1 }
 0x2ee   : > { %v814_v48 = vadd.f32 %v813_v47, %v678_v34  ;;  %v1699_v49 = vpop.f32.mrb[9].mxu1 }
 0x2ef   : > { %v816_v50 = vpop.f32.mrb[10].mxu1 }
 0x2f0   : > { %v1700_v51 = vpop.f32.mrb[11].mxu1  ;;  %v871_v52 = vsel %vm679_vm4, %v814_v48, -inf }
 0x2f1   : > { %872 = vmax.xlane.f32.xlu0 %v871_v52 }
 0x2f5   : > { %v859_v53 = vpop.f32.mrb[12].mxu1 }
 0x2f6   : > { %v860_v54 = vadd.f32 %v859_v53, %v678_v34  ;;  %v1705_v55 = vpop.f32.mrb[13].mxu1  ;;  %v1869_v53 = vld [vmem:[#allocation10] sm:$0xff]  }
 0x2f7   : > { %v862_v56 = vpop.f32.mrb[14].mxu1 }
 0x2f8   : > { %v1706_v57 = vpop.f32.mrb[15].mxu1  ;;  %v874_v58 = vsel %vm679_vm4, %v860_v54, -inf }
 0x2f9   : > { %875 = vmax.xlane.f32.xlu1 %v874_v58 }
 0x303   : > { %v867_v59 = vpop.xlane.xlu1 %866 }
 0x304   : > { %v877_v60 = vsub.f32 %v722_v36, %v867_v59 }
 0x306   : > { %v881_v61 = vmul.f32 1.442695, %v877_v60 }
 0x308   : > { %1877 = vpow2.f32 %v881_v61 }
 0x312   : > { %v1878_v62 = vpop.eup %1877 }
 0x313   : > { %v889_v63 = vsel %vm679_vm4, %v1878_v62, 0.0 }
 0x314   : > { %890 = vadd.xlane.f32.xlu0 %v889_v63 }
 0x376   : > { %v870_v4 = vpop.xlane.xlu0 %869 }
 0x377   : > { %v878_v5 = vsub.f32 %v768_v42, %v870_v4 }
 0x379   : > { %v883_v6 = vmul.f32 1.442695, %v878_v5 }
 0x37b   : > { %1879 = vpow2.f32 %v883_v6 }
 0x37e   : > { %v873_v7 = vpop.xlane.xlu0 %872 }
 0x37f   : > { %v879_v8 = vsub.f32 %v814_v48, %v873_v7  ;;  %v1137_v7 = vsub.s32 1, %v2530_v10 }
 0x381   : > { %v885_v9 = vmul.f32 1.442695, %v879_v8  ;;  %v1138_v8 = vrot.slane %v2536_v12, %v1137_v7  ;;  %v1393_v7 = vsub.s32 5, %v2530_v10 }
 0x383   : > { %1881 = vpow2.f32 %v885_v9 }
 0x385   : > { %v1880_v11 = vpop.eup %1879 }
 0x386   : > { %v876_v13 = vpop.xlane.xlu1 %875  ;;  %v892_v14 = vsel %vm679_vm4, %v1880_v11, 0.0 }
 0x387   : > { %v880_v15 = vsub.f32 %v860_v54, %v876_v13  ;;  %893 = vadd.xlane.f32.xlu1 %v892_v14  ;;  %v1870_v54 = vld [vmem:[#allocation10 + $0x8] sm:$0xff]  }
 0x389   : > { %v887_v16 = vmul.f32 1.442695, %v880_v15 }
 0x38b   : > { %1883 = vpow2.f32 %v887_v16 }
 0x38d   : > { %v1882_v17 = vpop.eup %1881 }
 0x38e   : > { %v895_v18 = vsel %vm679_vm4, %v1882_v17, 0.0 }
 0x38f   : > { %896 = vadd.xlane.f32.xlu0 %v895_v18 }
 0x395   : > { %v1884_v19 = vpop.eup %1883 }
 0x396   : > { %v898_v20 = vsel %vm679_vm4, %v1884_v19, 0.0 }
 0x397   : > { %899 = vadd.xlane.f32.xlu1 %v898_v20 }
 0x3a1   : > { %v891_v23 = vpop.xlane.xlu0 %890 }
 0x3a2   : > { %1885 = vrcp.f32 %v891_v23  ;;  %v1871_v23 = vld [vmem:[#allocation12] sm:$0xff]  }
 0x3ac   : > { %v1886_v24 = vpop.eup %1885 }
 0x3ad   : > { %v905_v26 = vmul.f32 %v1886_v24, %v1878_v62  ;;  %v1872_v24 = vld [vmem:[#allocation12 + $0x8] sm:$0xff]  }
 0x3af   : > { %v909_v27 = vpack.c.bf16 %v905_v26, %v905_v26 }
 0x3b1   : > { %1710 = vmatmul.mubr.msk.bf16.vlgmr.msra.gmra.mrb[4].mxu0 %vm679_vm4, %v909_v27 }
 0x3b2   : > { %1720 = vmatpush3.bf16.msra.mxu0 %v1013_v28  ;;  %1721 = vmatprep.mubr.msk.bf16.mxu0 %vm2147_vm0, %v2146_v0  ;;  %v1216_v28 = vsub.s32 3, %v2530_v10 }
 0x3b3   : > { %1731 = vmatprep.subr.bf16.mxu0 %v2146_v0 }
 0x3b4   : > { %v1217_v32 = vrot.slane %v2536_v12, %v1216_v28 }
 0x414   : > { %v894_v29 = vpop.xlane.xlu1 %893 }
 0x415   : > { %1887 = vrcp.f32 %v894_v29 }
 0x41c   : > { %v897_v30 = vpop.xlane.xlu0 %896 }
 0x41d   : > { %1889 = vrcp.f32 %v897_v30 }
 0x41f   : > { %v1888_v31 = vpop.eup %1887 }
 0x420   : > { %v906_v33 = vmul.f32 %v1888_v31, %v1880_v11 }
 0x422   : > { %v910_v34 = vpack.c.bf16 %v906_v33, %v906_v33 }
 0x424   : > { %1716 = vmatmul.mubr.msk.bf16.vlgmr.msra.gmra.mrb[16].mxu1 %vm679_vm4, %v910_v34  ;;  %v900_v36 = vpop.xlane.xlu1 %899 }
 0x425   : > { %1891 = vrcp.f32 %v900_v36  ;;  %1726 = vmatpush3.bf16.msra.mxu1 %v1059_v35  ;;  %1727 = vmatprep.mubr.msk.bf16.mxu1 %vm2147_vm0, %v2146_v0  ;;  %v1873_v36 = vld [vmem:[%s2750_s14] sm:$0xff]  }
 0x426   : > { %1739 = vmatprep.subr.bf16.mxu1 %v2146_v0 }
 0x427   : > { %v1890_v37 = vpop.eup %1889 }
 0x428   : > { %v907_v38 = vmul.f32 %v1890_v37, %v1882_v17  ;;  %v1874_v37 = vld [vmem:[%s2750_s14 + $0x8] sm:$0xff]  }
 0x42a   : > { %v911_v39 = vpack.c.bf16 %v907_v38, %v907_v38  ;;  %v1875_v38 = vld [vmem:[%s2750_s14 + $0x10] sm:$0xff]  }
 0x42c   : > { %1722 = vmatmul.mubr.msk.bf16.vlgmr.msra.gmra.mrb[8].mxu0 %vm679_vm4, %v911_v39  ;;  %v1876_v39 = vld [vmem:[%s2750_s14 + $0x18] sm:$0xff]  }
 0x42d   : > { %1735 = vmatprep.mubr.msk.bf16.mxu0 %vm2147_vm0, %v2146_v0  ;;  %1732 = vmatpush3.bf16.msra.mxu0 %v1869_v53 }
 0x42e   : > { %1733 = vmatprep.subr.bf16.mxu0 %v2146_v0 }
 0x42f   : > { %v1892_v40 = vpop.eup %1891 }
 0x430   : > { %v908_v41 = vmul.f32 %v1892_v40, %v1884_v19  ;;  %v1626_v40 = vld [vmem:[%s2751_s16] ss:$0 sm:$0xff] }
 0x431   : > { %1734 = vmatpush3.bf16.msra.mxu0 %v1870_v54 }
 0x432   : > { %v912_v42 = vpack.c.bf16 %v908_v41, %v908_v41  ;;  %1747 = vmatprep.subr.bf16.mxu0 %v2146_v0 }
 0x434   : > { %1728 = vmatmul.mubr.msk.bf16.vlgmr.msra.gmra.mrb[20].mxu1 %vm679_vm4, %v912_v42 }
 0x435   : > { %1743 = vmatprep.mubr.msk.bf16.mxu1 %vm2147_vm0, %v2146_v0  ;;  %1740 = vmatpush3.bf16.msra.mxu1 %v1871_v23 }
 0x436   : > { %1741 = vmatprep.subr.bf16.mxu1 %v2146_v0 }
 0x439   : > { %1742 = vmatpush3.bf16.msra.mxu1 %v1872_v24 }
 0x484   : > { %v957_v43 = vpop.f32.mrb[4].mxu0 }
 0x485   : > { %v1101_v44 = vpack.c.bf16 %v957_v43, %v957_v43  ;;  %v1711_v45 = vpop.f32.mrb[5].mxu0 }
 0x486   : > { %v960_v46 = vpop.f32.mrb[6].mxu0 }
 0x487   : > { %1102 = vst.msk [vmem:[#allocation3] sm:$0xf] %vm649_vm3, %v1101_v44  ;;  %v1712_v47 = vpop.f32.mrb[7].mxu0 }
 0x4f7   : > { %v1003_v48 = vpop.f32.mrb[16].mxu1 }
 0x4f8   : > { %v1642_v49 = vpack.c.bf16 %v1003_v48, %v1003_v48  ;;  %v1717_v50 = vpop.f32.mrb[17].mxu1 }
 0x4f9   : > { %v1006_v51 = vpop.f32.mrb[18].mxu1 }
 0x4fa   : > { %1107 = vrot.lane.b32.xlu0 %v1642_v49, %s2151_s26  ;;  %v1718_v52 = vpop.f32.mrb[19].mxu1  ;;  %v1302_v51 = vsub.s32 6, %v2530_v10  ;;  %s558_s26 = scalar_lea.vmem [#allocation13], %s1598_s17  ;;  %s2047_s17 = sshll.u32 %s2154_s20, 4  ;;  %s2048_s17 = int_to_ptr.vmem [resolvable:$false] %s2047_s17 }
 0x4fb   : > { %s2049_s27 = scalar_lea.vmem %s2048_s17, 256 }
 0x4fc   : > { %v1303_v52 = vrot.slane %v2536_v12, %v1302_v51 }
 0x4ff   : > { %v1049_v55 = vpop.f32.mrb[8].mxu0 }
 0x500   : > { %v1643_v56 = vpack.c.bf16 %v1049_v55, %v1049_v55  ;;  %v1723_v57 = vpop.f32.mrb[9].mxu0 }
 0x501   : > { %v1052_v58 = vpop.f32.mrb[10].mxu0 }
 0x502   : > { %v1724_v59 = vpop.f32.mrb[11].mxu0  ;;  %1116 = vrot.lane.b32.xlu1 %v1643_v56, %s2152_s25  ;;  %s1412_s25 = sshll.u32 %s558_s26, 4  ;;  %s2651_s25 = int_to_ptr.vmem [resolvable:$true] %s1412_s25 }
 0x503   : > { %s2043_s1 = scalar_lea.vmem %s2651_s25, 128  ;;  %p2050_p3 = scmp.lt.s32.totalorder %s2651_s25, %s2048_s17 }
 0x504   : > { %p2044_p8 = scmp.ne.s32.totalorder %s2651_s25, %s2043_s1  ;;  %p2051_p5 = scmp.lt.s32.totalorder %s2049_s27, %s2043_s1 }
 0x506   : > { %p2045_p1 = pnand %p2044_p8, %p2371_p10  ;;  %p2052_p11 = por %p2051_p5, %p2050_p3 }
 0x507   : > { %v1095_v60 = vpop.f32.mrb[20].mxu1 }
 0x508   : > { %v1644_v61 = vpack.c.bf16 %v1095_v60, %v1095_v60  ;;  %v1729_v62 = vpop.f32.mrb[21].mxu1  ;;  %p2046_p13 = pneg %p2045_p1 }
 0x509   : > { %v1098_v63 = vpop.f32.mrb[22].mxu1 }
 0x50a   : > { %1125 = vrot.lane.b32.xlu1 %v1644_v61, %s2153_s10  ;;  %v1730_v1 = vpop.f32.mrb[23].mxu1  ;;  %p2053_p12 = pnand %p2052_p11, %p2046_p13 }
 0x56c   : > { %v1108_v2 = vpop.permute.xlu0 %1107 }
 0x56d   : > { %1111 = vst.msk [vmem:[#allocation3] sm:$0xf] %vm1110_vm5, %v1108_v2 }
 0x574   : > { %v1117_v4 = vpop.permute.xlu1 %1116 }
 0x575   : > { %1120 = vst.msk [vmem:[#allocation3] sm:$0xf] %vm1119_vm6, %v1117_v4 }
 0x57c   : > { %v1126_v5 = vpop.permute.xlu1 %1125 }
 0x57d   : > { %1129 = vst.msk [vmem:[#allocation3] sm:$0xf] %vm1128_vm7, %v1126_v5 }
 0x584   : > { %v1130_v6 = vld [vmem:[#allocation3] sm:$0xf] }
 0x585   : > { %1736 = vmatmul.mubr.msk.bf16.vlgmr.msra.gmra.mrb[12].mxu0 %vm604_vm1, %v1130_v6  ;;  %v1388_v6 = vsub.s32 4, %v2530_v10 }
 0x586   : > { %1755 = vmatprep.mubr.msk.bf16.mxu0 %vm2147_vm0, %v2146_v0  ;;  %1748 = vmatpush3.bf16.msra.mxu0 %v1873_v36 }
 0x587   : > { %1749 = vmatprep.subr.bf16.mxu0 %v2146_v0 }
 0x58a   : > { %1750 = vmatpush3.bf16.msra.mxu0 %v1874_v37 }
 0x58b   : > { %1751 = vmatprep.subr.bf16.mxu0 %v2146_v0 }
 0x58e   : > { %1752 = vmatpush3.bf16.msra.mxu0 %v1875_v38 }
 0x58f   : > { %1753 = vmatprep.subr.bf16.mxu0 %v2146_v0 }
 0x592   : > { %1754 = vmatpush3.bf16.msra.mxu0 %v1876_v39 }
 0x658   : > { %v1188_v9 = vpop.f32.mrb[12].mxu0 }
 0x659   : > { %v1189_v11 = vadd.f32 %v1188_v9, %v1138_v8  ;;  %v1737_v13 = vpop.f32.mrb[13].mxu0  ;;  %v1389_v8 = vrot.slane %v2536_v12, %v1388_v6 }
 0x65a   : > { %v1191_v14 = vpop.f32.mrb[14].mxu0  ;;  %v1394_v13 = vrot.slane %v2536_v12, %v1393_v7 }
 0x65b   : > { %v1738_v15 = vpop.f32.mrb[15].mxu0  ;;  %v1194_v16 = vadd.f32 %v1189_v11, %v2513_v3  ;;  %v1211_v3 = vsub.s32 2, %v2530_v10 }
 0x65d   : > { %v1195_v17 = vsel %vm604_vm1, %v1194_v16, 0.0  ;;  %v1212_v29 = vrot.slane %v2536_v12, %v1211_v3 }
 0x65e   : > { %1196 = vadd.xlane.f32.xlu0 %v1195_v17 }
 0x6eb   : > { %v1197_v18 = vpop.xlane.xlu0 %1196 }
 0x6ec   : > { %v1199_v19 = vmul.f32 0.03125, %v1197_v18 }
 0x6ee   : > { %v1200_v20 = vsub.f32 %v1194_v16, %v1199_v19 }
 0x6f0   : > { %v1201_v21 = vmul.f32 %v1200_v20, %v1200_v20 }
 0x6f2   : > { %v1202_v22 = vsel %vm604_vm1, %v1201_v21, 0.0 }
 0x6f3   : > { %1203 = vadd.xlane.f32.xlu1 %v1202_v22 }
 0x780   : > { %v1204_v25 = vpop.xlane.xlu1 %1203 }
 0x781   : > { %v1205_v26 = vmul.f32 0.03125, %v1204_v25 }
 0x783   : > { %v1206_v27 = vadd.f32 1e-05, %v1205_v26 }
 0x785   : > { %1893 = vrsqrt.f32 %v1206_v27 }
 0x78f   : > { %v1894_v30 = vpop.eup %1893 }
 0x790   : > { %v1208_v31 = vmul.f32 %v1894_v30, %v1200_v20 }
 0x792   : > { %v1213_v33 = vmul.f32 %v1212_v29, %v1208_v31 }
 0x794   : > { %v1218_v34 = vadd.f32 %v1217_v32, %v1213_v33 }
 0x796   : > { %v1219_v35 = vpack.c.bf16 %v1218_v34, %v1218_v34 }
 0x798   : > { %1744 = vmatmul.mubr.msk.bf16.vlgmr.msra.gmra.mrb[24].mxu1 %vm604_vm1, %v1219_v35 }
 0x86b   : > { %v1280_v41 = vpop.f32.mrb[24].mxu1 }
 0x86c   : > { %v1281_v42 = vadd.f32 %v1626_v40, %v1280_v41  ;;  %v1745_v43 = vpop.f32.mrb[25].mxu1 }
 0x86d   : > { %v1283_v44 = vpop.f32.mrb[26].mxu1 }
 0x86e   : > { %v1287_v45 = vmul.f32 0.70710677, %v1281_v42  ;;  %v1746_v46 = vpop.f32.mrb[27].mxu1  ;;  %v1286_v48 = vmul.f32 0.5, %v1281_v42 }
 0x870   : > { %1895 = verf.f32 %v1287_v45 }
 0x87a   : > { %v1896_v47 = vpop.eup %1895 }
 0x87b   : > { %v1289_v49 = vadd.f32 1.0, %v1896_v47 }
 0x87d   : > { %v1290_v0 = vmul.f32 %v1289_v49, %v1286_v48 }
 0x87f   : > { %v1291_v50 = vpack.c.bf16 %v1290_v0, %v1290_v0 }
 0x881   : > { %1756 = vmatmul.mubr.msk.bf16.vlgmr.msra.gmra.mrb[16].mxu0 %vm1328_vm8, %v1291_v50 }
 0x954   : > { %v1366_v53 = vpop.f32.mrb[16].mxu0 }
 0x955   : > { %v1367_v54 = vadd.f32 %v1366_v53, %v1303_v52  ;;  %v1757_v55 = vpop.f32.mrb[17].mxu0 }
 0x956   : > { %v1369_v56 = vpop.f32.mrb[18].mxu0 }
 0x957   : > { %v1758_v57 = vpop.f32.mrb[19].mxu0  ;;  %v1372_v58 = vadd.f32 %v1367_v54, %v1218_v34 }
 0x959   : > { %v1373_v59 = vsel %vm604_vm1, %v1372_v58, 0.0 }
 0x95a   : > { %1374 = vadd.xlane.f32.xlu0 %v1373_v59 }
 0x9e7   : > { %v1375_v60 = vpop.xlane.xlu0 %1374 }
 0x9e8   : > { %v1376_v61 = vmul.f32 0.03125, %v1375_v60 }
 0x9ea   : > { %v1377_v62 = vsub.f32 %v1372_v58, %v1376_v61 }
 0x9ec   : > { %v1378_v63 = vmul.f32 %v1377_v62, %v1377_v62 }
 0x9ee   : > { %v1379_v1 = vsel %vm604_vm1, %v1378_v63, 0.0 }
 0x9ef   : > { %1380 = vadd.xlane.f32.xlu0 %v1379_v1 }
 0xa7c   : > { %v1381_v2 = vpop.xlane.xlu0 %1380 }
 0xa7d   : > { %v1382_v4 = vmul.f32 0.03125, %v1381_v2 }
 0xa7f   : > { %v1383_v5 = vadd.f32 1e-05, %v1382_v4 }
 0xa81   : > { %1897 = vrsqrt.f32 %v1383_v5 }
 0xa8b   : > { %v1898_v9 = vpop.eup %1897 }
 0xa8c   : > { %v1385_v11 = vmul.f32 %v1898_v9, %v1377_v62 }
 0xa8e   : > { %v1390_v14 = vmul.f32 %v1389_v8, %v1385_v11 }
 0xa90   : > { %v1395_v15 = vadd.f32 %v1394_v13, %v1390_v14 }
 0xa92   : > { %1396 = vst.msk [vmem:[%s558_s26] sm:$0xff] %vm604_vm1, %v1395_v15 }
 0xa93   : > { %2056 = shalt.err (!%p2053_p12)
}
 0xa94   : > { %s2057_s9 = scalar_lea.hbm %s2649_s13, 128  ;;  %s2061_s11 = scalar_lea.hbm %s2752_s5, 256 }
 0xa95   : > { %p2058_p6 = scmp.ne.s32.totalorder %s2649_s13, %s2057_s9  ;;  %p2062_p0 = scmp.lt.u32.totalorder %s2649_s13, %s2752_s5 }
 0xa96   : > { %p2063_p2 = scmp.lt.u32.totalorder %s2061_s11, %s2057_s9  ;;  %p2065_p8 = scmp.lt.u32.totalorder %s2057_s9, %s2649_s13 }
 0xa97   : > { %p2059_p7 = pnand %p2058_p6, %p2371_p10 }
 0xa98   : > { %p2064_p4 = por %p2063_p2, %p2062_p0 }
 0xa99   : > { %p2060_p9 = pneg %p2059_p7 }
 0xa9a   : > { %p2066_p1 = por %p2065_p8, %p2064_p4 }
 0xa9c   : > { %p2067_p13 = pnand %p2066_p1, %p2060_p9 }
 0xa9e   : > { %2070 = shalt.err (!%p2067_p13)
}
 0xa9f   : > { %1775 = dma.vmem_to_hbm [thread:$0]  (%p2371_p10), %s2651_s25, 128, %s2649_s13, %s1398_s2  }
 0xaa0 PF: > { %s2753_s29 = sld [smem:[#allocation19_spill]]  ;;  %s2754_s26 = sld [smem:[#allocation20_spill]] }
 0xaa1   : > { %p2756_p5 = scmp.ge.s32.totalorder %s2137_s22, 2 }
 0xaa6   : > { %s1424_s10 = sand.u32 1, %s2753_s29   ;;  %p2755_p3 = scmp.ne.s32.totalorder %s2754_s26, 0 }
 0xaa7   : > { %s1425_s15 = scalar_lea.sflag [#allocation6], %s1424_s10 }
 0xaa8   : > { %p1795_p11 = pnand %p2756_p5, %p2755_p3 }
 0xaaa   : > { %2112 = dma.done.wait (!%p1795_p11), %s1425_s15, 128  }
 0xaab   : > { %2114 = vsyncadd (!%p1795_p11), %s1425_s15, 4294967168  ;;  %s31_s22 = sadd.s32 1, %s2137_s22   ;;  %s2757_s17 = smov %s2121_s18 }
 0xaac   : > { %p28_p12 = scmp.ge.s32.totalorder %s31_s22, 4   ;;  %s2758_s18 = smov %s2125_s19 }
 0xaad   : > { %s2759_s19 = smov %s2386_s28  ;;  %s2760_s20 = smov %s2133_s21 }
 0xaae   : > { %s2761_s21 = smov %s2763_s30  ;;  %30 = sbr.rel (!%p28_p12) target bundleno = 17 (0x11), region = 146 }
 0xab5   :  { %1430 = vsyncpa [#allocation5], 1 }
 0xab6   :  { %1432 = vsyncpa [#allocation5 + $0x1], 1 }
 0xab7   :  { %1433 = vsyncpa [#allocation8], 1 }
 0xab8   :  { %1435 = vsyncpa [#allocation8 + $0x1], 1 }
 0xab9   :  { %1436 = vsyncpa [#allocation11], 1 }
 0xaba   :  { %1437 = vsyncpa [#allocation6], 1 }
 0xabb   :  { %1439 = vsyncpa [#allocation6 + $0x1], 1 }

// kernel: tpu_custom_call.1
= control target key start
LH: loop header
LB: loop body
LE: loop exit
PB: predicated region body
PF: predicated region fallthrough
CT: control target
= control target key end

     0   :  { %s2699_s0 = inlined_call_operand.vmem [shape: f32[2,8,32], index: 0, kind: input, shape index: {}]   ;;  %s2700_s1 = inlined_call_operand.hbm [shape: f32[2,8,32], index: 1, kind: input, shape index: {}]   ;;  %s2701_s2 = inlined_call_operand.vmem [shape: bf16[2,1,8,8], index: 2, kind: input, shape index: {}]   ;;  %s2702_s3 = inlined_call_operand.vmem [shape: bf16[2,4,8,8], index: 3, kind: input, shape index: {}]   ;;  %s2703_s4 = inlined_call_operand.hbm [shape: bf16[2,4,8,8], index: 4, kind: input, shape index: {}]   ;;  %s2704_s5 = inlined_call_operand.hbm [shape: bf16[32,32], index: 5, kind: input, shape index: {}]   ;;  %s2705_s6 = inlined_call_operand.hbm [shape: bf16[32,32], index: 6, kind: input, shape index: {}]   ;;  %s2706_s7 = inlined_call_operand.hbm [shape: bf16[32,64], index: 7, kind: input, shape index: {}]   ;;  %s2707_s8 = inlined_call_operand.vmem [shape: bf16[64,32], index: 8, kind: input, shape index: {}]   ;;  %s2708_s9 = inlined_call_operand.vmem [shape: f32[7,32], index: 9, kind: input, shape index: {}]   ;;  %s2709_s10 = inlined_call_operand.vmem [shape: f32[1,64], index: 10, kind: input, shape index: {}]   ;;  %s2710_s11 = inlined_call_operand.hbm [shape: f32[2,8,32], index: 11, kind: output, shape index: {}]  }
   0x1   :  { %2720 = sst [smem:[#allocation21_spill]] %s2700_s1 }
   0x2   :  { %2721 = sst [smem:[#allocation22_spill]] %s2701_s2 }
   0x3   :  { %2722 = sst [smem:[#allocation23_spill]] %s2704_s5 }
   0x4   :  { %2723 = sst [smem:[#allocation24_spill]] %s2707_s8 }
   0x5   :  { %2724 = sst [smem:[#allocation25_spill]] %s2708_s9 }
   0x6   :  { %2725 = sst [smem:[#allocation26_spill]] %s2709_s10 }
   0x7   :  { %2726 = sst [smem:[#allocation27_spill]] %s2710_s11 }
   0x8   :  { %16 = vsyncpa [#allocation5], 0 }
   0x9   :  { %18 = vsyncpa [#allocation5 + $0x1], 0 }
   0xa   :  { %19 = vsyncpa [#allocation8], 0 }
   0xb   :  { %21 = vsyncpa [#allocation8 + $0x1], 0 }
   0xc   :  { %22 = vsyncpa [#allocation11], 0 }
   0xd   :  { %23 = vsyncpa [#allocation6], 0 }
   0xe   :  { %25 = vsyncpa [#allocation6 + $0x1], 0  ;;  %s2215_s17 = smov 0   ;;  %s2217_s18 = smov 0  }
   0xf   :  { %s2219_s19 = smov 0   ;;  %s2221_s20 = smov 0  }
  0x10   :  { %s2223_s21 = smov 0   ;;  %s2225_s22 = smov 0  }
  0x11 LB: > { %2727 = sst [smem:[#allocation19_spill]] %s2117_s17  ;;  %s2246_s23 = sadd.s32 4294967295, %s2137_s22   ;;  %s2137_s22 = sphi %s2225_s22, %s31_s22   ;;  %s2133_s21 = sphi %s2223_s21, %s2761_s21   ;;  %s2129_s20 = sphi %s2221_s20, %s2760_s20   ;;  %s2125_s19 = sphi %s2219_s19, %s2759_s19   ;;  %s2121_s18 = sphi %s2217_s18, %s2758_s18   ;;  %s2117_s17 = sphi %s2215_s17, %s2757_s17  }
  0x12   : > { %s1586_s24 = sadd.s32 4294967294, %s2137_s22   ;;  %p93_p0 = scmp.ne.s32.totalorder %s2121_s18, %s2117_s17 }
  0x13   : > { %p2714_p1 = scmp.eq.s32.totalorder %s2246_s23, 0  ;;  %p331_p3 = scmp.eq.s32.totalorder %s1586_s24, 1 }
  0x14   : > { %p1587_p5 = scmp.ge.s32.totalorder %s2137_s22, 1  ;;  %p338_p7 = scmp.lt.s32.totalorder %s2137_s22, 3 }
  0x15   : > { %p2255_p4 = por %p2714_p1, %p93_p0  ;;  %p2260_p6 = por %p331_p3, %p93_p0 }
  0x16   : > { %p2265_p8 = pnand %p1587_p5, %p338_p7  ;;  %s2139_s28 = smov [#allocation9]  }
  0x17   : > { %s2728_s25 = scalar_select %p2255_p4, 1, 0 }
  0x18   : > { %s2729_s26 = scalar_select %p2260_p6, 1, 0 }
  0x19   : > { %s2731_s27 = scalar_select %p2265_p8, 1, 0 }
  0x1a   : > { %2730 = sst [smem:[#allocation20_spill]] %s2729_s26  ;;  %s350_s29 = sshll.u32 %s2139_s28, 4  ;;  %s2269_s29 = int_to_ptr.vmem [resolvable:$true] %s350_s29 }
  0x1b   : > { %p1777_p9 = pneg %p2265_p8  ;;  %s2140_s12 = smov [#allocation10]  }
  0x1c   : > { %s363_s13 = sshll.u32 %s2140_s12, 4  ;;  %s2141_s14 = smov [#allocation12]   ;;  %s2280_s13 = int_to_ptr.vmem [resolvable:$true] %s363_s13 }
  0x1d   : > { %p2276_p11 = pnand %p1777_p9, %p2714_p1  ;;  %s2282_s15 = sshll.u32 %s2141_s14, 4  ;;  %s377_s15 = int_to_ptr.vmem [resolvable:$true] %s2282_s15 }
  0x1e   : > { %s2733_s5 = sld [smem:[#allocation23_spill]] }
  0x1f   : > { %p2292_p13 = pneg %p2276_p11 }
  0x24   : > { %s1899_s28 = scalar_lea.hbm %s2733_s5, 256 }
  0x25   : > { %p1900_p12 = scmp.ne.s32.totalorder %s2733_s5, %s1899_s28  ;;  %p1906_p5 = scmp.lt.u32.totalorder %s1899_s28, %s2733_s5 }
  0x27   : > { %p1902_p0 = pnand %p2292_p13, %p1900_p12 }
  0x29   : > { %p1903_p3 = pneg %p1902_p0 }
  0x2b   : > { %p1908_p7 = pnand %p1906_p5, %p1903_p3 }
  0x2d   : > { %1911 = shalt.err (!%p1908_p7)
}
  0x2e   : > { %s1912_s17 = scalar_lea.vmem %s2269_s29, 256  ;;  %p1920_p2 = scmp.lt.s32.totalorder %s2269_s29, %s2269_s29 }
  0x2f   : > { %p1913_p9 = scmp.ne.s32.totalorder %s2269_s29, %s1912_s17  ;;  %p1921_p6 = scmp.lt.s32.totalorder %s1912_s17, %s1912_s17 }
  0x31   : > { %p1915_p10 = pnand %p1913_p9, %p2292_p13  ;;  %p1922_p12 = por %p1921_p6, %p1920_p2 }
  0x33   : > { %p1916_p1 = pneg %p1915_p10 }
  0x35   : > { %p1923_p0 = pnand %p1922_p12, %p1916_p1 }
  0x37   : > { %1926 = shalt.err (!%p1923_p0)
}
  0x38   : > { %s2718_s26 = smov 64   ;;  %s2719_s16 = smov 4  }
  0x39   : > { %1780 = dma.hbm_to_vmem [thread:$0]  (!%p2276_p11), %s2733_s5, 256, %s2269_s29, [#allocation8], %s2718_s26, %s2718_s26, %s2719_s16  }
  0x3a   : > { %s1927_s17 = scalar_lea.hbm %s2705_s6, 256 }
  0x3b   : > { %p1928_p1 = scmp.ne.s32.totalorder %s2705_s6, %s1927_s17  ;;  %p1934_p10 = scmp.lt.u32.totalorder %s1927_s17, %s2705_s6 }
  0x3d   : > { %p1930_p2 = pnand %p1928_p1, %p2292_p13 }
  0x3f   : > { %p1931_p6 = pneg %p1930_p2 }
  0x41   : > { %p1936_p3 = pnand %p1934_p10, %p1931_p6 }
  0x43   : > { %1939 = shalt.err (!%p1936_p3)
}
  0x44   : > { %s1940_s29 = scalar_lea.vmem %s2280_s13, 256  ;;  %p1948_p12 = scmp.lt.s32.totalorder %s2280_s13, %s2280_s13 }
  0x45   : > { %p1941_p5 = scmp.ne.s32.totalorder %s2280_s13, %s1940_s29  ;;  %p1949_p0 = scmp.lt.s32.totalorder %s1940_s29, %s1940_s29 }
  0x47   : > { %p1943_p7 = pnand %p1941_p5, %p2292_p13  ;;  %p1950_p1 = por %p1949_p0, %p1948_p12 }
  0x49   : > { %p1944_p9 = pneg %p1943_p7 }
  0x4b   : > { %p1951_p2 = pnand %p1950_p1, %p1944_p9 }
  0x4d   : > { %1954 = shalt.err (!%p1951_p2)
}
  0x4e   : > { %1783 = dma.hbm_to_vmem [thread:$0]  (!%p2276_p11), %s2705_s6, 256, %s2280_s13, [#allocation11], %s2718_s26, %s2718_s26, %s2719_s16  }
  0x4f   : > { %s1955_s24 = scalar_lea.hbm %s2706_s7, 256 }
  0x50   : > { %p1956_p6 = scmp.ne.s32.totalorder %s2706_s7, %s1955_s24  ;;  %p1962_p5 = scmp.lt.u32.totalorder %s1955_s24, %s2706_s7 }
  0x52   : > { %p1958_p10 = pnand %p1956_p6, %p2292_p13 }
  0x54   : > { %p1959_p3 = pneg %p1958_p10 }
  0x56   : > { %p1964_p7 = pnand %p1962_p5, %p1959_p3 }
  0x58   : > { %1967 = shalt.err (!%p1964_p7)
}
  0x59   : > { %s1968_s29 = scalar_lea.vmem %s377_s15, 256  ;;  %p1976_p1 = scmp.lt.s32.totalorder %s377_s15, %s377_s15 }
  0x5a   : > { %p1969_p9 = scmp.ne.s32.totalorder %s377_s15, %s1968_s29  ;;  %p1977_p2 = scmp.lt.s32.totalorder %s1968_s29, %s1968_s29 }
  0x5c   : > { %p1971_p12 = pnand %p1969_p9, %p2292_p13  ;;  %p1978_p4 = por %p1977_p2, %p1976_p1 }
  0x5e   : > { %p1972_p0 = pneg %p1971_p12 }
  0x60   : > { %p1979_p8 = pnand %p1978_p4, %p1972_p0 }
  0x62   : > { %1982 = shalt.err (!%p1979_p8)
}
  0x63   : > { %1786 = dma.hbm_to_vmem [thread:$0]  (!%p2276_p11), %s2706_s7, 256, %s377_s15, [#allocation11], %s2718_s26, %s2718_s26, %s2719_s16  }
  0x64   : > { %s80_s11 = sadd.s32 1, %s2125_s19  ;;  %s43_s30 = sadd.s32 1, %s2133_s21 }
  0x65   : > { %p87_p4 = scmp.ne.s32.totalorder %s2125_s19, %s2121_s18  ;;  %p45_p8 = scmp.ge.s32.totalorder %s43_s30, 2 }
  0x66   : > { %p88_p13 = scmp.eq.s32.totalorder %s2137_s22, 0  ;;  %p2735_p6 = scmp.eq.s32.totalorder %s2246_s23, 1 }
  0x67   : > { %p1801_p3 = scmp.lt.s32.totalorder %s2137_s22, 2  ;;  %s2763_s30 = smov (%p45_p8, %s43_s30), 0 }
  0x68   : > { %p2371_p10 = por %p2735_p6, %p87_p4  ;;  %p89_p5 = por %p88_p13, %p87_p4 }
  0x69   : > { %s2379_s9 = sand.u32 1, %s2125_s19   ;;  %s75_s15 = ssub.s32 %s2133_s21, %s2763_s30 }
  0x6a   : > { %p78_p11 = scmp.eq.s32.totalorder %s75_s15, 0  ;;  %s1592_s10 = sshll.u32 %s2379_s9, 3 }
  0x6b   : > { %s1593_s24 = sshll.u32 %s2133_s21, 7  ;;  %s2737_s1 = sld [smem:[#allocation21_spill]] }
  0x6c   : > { %s2386_s28 = scalar_select %p78_p11, %s2125_s19, %s80_s11  }
  0x6d   : > { %s413_s29 = scalar_lea.vmem [#allocation4], %s1592_s10  ;;  %p2397_p7 = pnand %p1801_p3, %p89_p5 }
  0x6e   : > { %s421_s13 = sshll.u32 %s413_s29, 4  ;;  %s1594_s11 = sshll.u32 %s2379_s9, 4  ;;  %s2393_s13 = int_to_ptr.vmem [resolvable:$true] %s421_s13 }
  0x6f   : > { %s410_s12 = scalar_lea.sflag [#allocation5], %s2379_s9  ;;  %p1985_p12 = pneg %p2397_p7 }
  0x71   : > { %s2391_s17 = scalar_lea.hbm %s2737_s1, %s1593_s24  ;;  %s1988_s29 = scalar_lea.hbm %s2737_s1, 256 }
  0x72   : > { %s1983_s24 = scalar_lea.hbm %s2391_s17, 128  ;;  %p1989_p2 = scmp.lt.u32.totalorder %s2391_s17, %s2737_s1 }
  0x73   : > { %p1984_p9 = scmp.ne.s32.totalorder %s2391_s17, %s1983_s24  ;;  %p1990_p4 = scmp.lt.u32.totalorder %s1988_s29, %s1983_s24 }
  0x74   : > { %p1992_p13 = scmp.lt.u32.totalorder %s1983_s24, %s2391_s17 }
  0x75   : > { %p1986_p0 = pnand %p1985_p12, %p1984_p9  ;;  %p1991_p8 = por %p1990_p4, %p1989_p2 }
  0x77   : > { %p1987_p1 = pneg %p1986_p0  ;;  %p1993_p6 = por %p1992_p13, %p1991_p8 }
  0x79   : > { %p1994_p3 = pnand %p1993_p6, %p1987_p1 }
  0x7b   : > { %1997 = shalt.err (!%p1994_p3)
}
  0x7c   : > { %s1998_s15 = scalar_lea.vmem %s2393_s13, 128  ;;  %s2144_s10 = smov [#allocation4]  }
  0x7d   : > { %p1999_p5 = scmp.ne.s32.totalorder %s2393_s13, %s1998_s15  ;;  %s2003_s14 = sshll.u32 %s2144_s10, 4  ;;  %s2004_s14 = int_to_ptr.vmem [resolvable:$false] %s2003_s14 }
  0x7e   : > { %s2005_s26 = scalar_lea.vmem %s2004_s14, 256  ;;  %p2006_p0 = scmp.lt.s32.totalorder %s2393_s13, %s2004_s14 }
  0x7f   : > { %p2001_p11 = pnand %p1999_p5, %p1985_p12  ;;  %p2007_p2 = scmp.lt.s32.totalorder %s2005_s26, %s1998_s15 }
  0x81   : > { %p2002_p9 = pneg %p2001_p11  ;;  %p2008_p4 = por %p2007_p2, %p2006_p0 }
  0x83   : > { %p2009_p8 = pnand %p2008_p4, %p2002_p9 }
  0x85   : > { %2012 = shalt.err (!%p2009_p8)
}
  0x86   : > { %1790 = dma.hbm_to_vmem [thread:$0]  (!%p2397_p7), %s2391_s17, 128, %s2393_s13, %s410_s12  }
  0x87   : > { %s450_s16 = scalar_lea.vmem [#allocation7], %s1594_s11  ;;  %s446_s29 = sand.u32 1, %s2137_s22  }
  0x88   : > { %s457_s24 = sshll.u32 %s450_s16, 4  ;;  %s2739_s10 = sshll.u32 %s2133_s21, 8  ;;  %s2432_s24 = int_to_ptr.vmem [resolvable:$true] %s457_s24 }
  0x89   : > { %s2439_s26 = scalar_lea.hbm %s2703_s4, %s2739_s10  ;;  %s2441_s1 = scalar_lea.sflag [#allocation8], %s446_s29 }
  0x8a   : > { %s2013_s5 = scalar_lea.hbm %s2439_s26, 256  ;;  %s2018_s13 = scalar_lea.hbm %s2703_s4, 512 }
  0x8b   : > { %p2014_p1 = scmp.ne.s32.totalorder %s2439_s26, %s2013_s5  ;;  %p2019_p3 = scmp.lt.u32.totalorder %s2439_s26, %s2703_s4 }
  0x8c   : > { %p2020_p5 = scmp.lt.u32.totalorder %s2018_s13, %s2013_s5  ;;  %p2022_p9 = scmp.lt.u32.totalorder %s2013_s5, %s2439_s26 }
  0x8d   : > { %p2016_p13 = pnand %p2014_p1, %p1985_p12 }
  0x8e   : > { %p2021_p11 = por %p2020_p5, %p2019_p3 }
  0x8f   : > { %p2017_p6 = pneg %p2016_p13 }
  0x90   : > { %p2023_p0 = por %p2022_p9, %p2021_p11 }
  0x92   : > { %p2024_p2 = pnand %p2023_p0, %p2017_p6 }
  0x94   : > { %2027 = shalt.err (!%p2024_p2)
}
  0x95   : > { %s2028_s16 = scalar_lea.vmem %s2432_s24, 256  ;;  %s2145_s29 = smov [#allocation7]  }
  0x96   : > { %p2029_p4 = scmp.ne.s32.totalorder %s2432_s24, %s2028_s16  ;;  %s2033_s10 = sshll.u32 %s2145_s29, 4  ;;  %s2034_s10 = int_to_ptr.vmem [resolvable:$false] %s2033_s10 }
  0x97   : > { %s2035_s15 = scalar_lea.vmem %s2034_s10, 512  ;;  %p2036_p13 = scmp.lt.s32.totalorder %s2432_s24, %s2034_s10 }
  0x98   : > { %p2031_p8 = pnand %p2029_p4, %p1985_p12  ;;  %p2037_p3 = scmp.lt.s32.totalorder %s2035_s15, %s2028_s16 }
  0x9a   : > { %p2032_p1 = pneg %p2031_p8  ;;  %p2038_p5 = por %p2037_p3, %p2036_p13 }
  0x9c   : > { %p2039_p11 = pnand %p2038_p5, %p2032_p1 }
  0x9e   : > { %2042 = shalt.err (!%p2039_p11)
}
  0x9f   : > { %s2740_s5 = smov 4   ;;  %s2741_s14 = smov 64  }
  0xa0   : > { %1793 = dma.hbm_to_vmem [thread:$0]  (!%p2397_p7), %s2439_s26, 256, %s2432_s24, %s2441_s1, %s2741_s14, %s2741_s14, %s2740_s5  }
  0xa1   : > { %p2742_p12 = scmp.ne.s32.totalorder %s2731_s27, 0 }
  0xa2   : > { %s2473_s9 = sand.u32 (!%p2742_p12), 1, %s2121_s18   ;;  %p2743_p6 = scmp.ne.s32.totalorder (!%p2742_p12), %s2728_s25, 0 }
  0xa3   : > { %469 = sbr.rel (%p2742_p12) target bundleno = 2720 (0xaa0), region = 64  ;;  %s1598_s17 = sshll.u32 (!%p2742_p12), %s2473_s9, 3 }
  0xa4   : > { %s472_s13 = scalar_lea.sflag (!%p2742_p12), [#allocation5], %s2473_s9  ;;  %s475_s2 = scalar_lea.vmem (!%p2742_p12), [#allocation4], %s1598_s17 }
  0xaa   : > { %2096 = dma.done.wait (%p2743_p6), %s472_s13, 128  }
  0xab   : > { %2098 = vsyncadd (%p2743_p6), %s472_s13, 4294967168  ;;  %s480_s1 = sand.u32 1, %s2246_s23   ;;  %s1599_s27 = sshll.u32 %s2473_s9, 4 }
  0xac   : > { %s481_s24 = scalar_lea.sflag [#allocation8], %s480_s1  ;;  %s2485_s26 = scalar_lea.vmem [#allocation7], %s1599_s27 }
  0xad   : > { %2100 = dma.done.wait (%p2743_p6), %s481_s24, 256  }
  0xae   : > { %2102 = vsyncadd (%p2743_p6), %s481_s24, 4294967040  ;;  %p2744_p7 = scmp.eq.s32.totalorder %s2246_s23, 0 }
  0xb0   : > { %2104 = dma.done.wait (%p2744_p7), [#allocation8], 256   ;;  %p2745_p9 = pmov %p2744_p7 }
  0xb1   : > { %p2746_p0 = pmov %p2744_p7 }
  0xb2   : > { %2106 = vsyncadd (%p2745_p9), [#allocation8], 4294967040 }
  0xb3   : > { %2108 = dma.done.wait (%p2746_p0), [#allocation11], 512   ;;  %p2747_p2 = pmov %p2746_p0 }
  0xb4   : > { %p559_p4 = scmp.lt.s32.totalorder %s2129_s20, 1  ;;  %v2146_v0 = vmov 0.0   ;;  %vm2147_vm0 = vmmov 0   ;;  %v1867_v1 = vld [vmem:[#allocation9] sm:$0xff]   ;;  %v1868_v2 = vld [vmem:[#allocation9 + $0x8] sm:$0xff]   ;;  %v581_v4 = vld [vmem:[%s475_s2] sm:$0xff]  ;;  %v588_v9 = vlaneseq }
  0xb5   : > { %2110 = vsyncadd (%p2747_p2), [#allocation11], 4294966784  ;;  %1675 = vmatprep.subr.bf16.mxu0 %v2146_v0  ;;  %1679 = vmatprep.mubr.msk.bf16.mxu0 %vm2147_vm0, %v2146_v0  ;;  %vm604_vm1 = vcmask 261120   ;;  %vm683_vm2 = vcmask 1043456   ;;  %s2748_s2 = sld [smem:[#allocation25_spill]]  ;;  %vm649_vm3 = vcmask 60416  }
  0xb6   : > { %s2504_s25 = scalar_select %p559_p4, %s2129_s20, 1  ;;  %1683 = vmatprep.subr.bf16.mxu1 %v2146_v0  ;;  %1685 = vmatprep.mubr.msk.bf16.mxu1 %vm2147_vm0, %v2146_v0  ;;  %v2530_v10 = vshrl.u32 %v588_v9, 7  ;;  %vm679_vm4 = vcmask 64512   ;;  %vm1110_vm5 = vcmask 126016   ;;  %vm1119_vm6 = vcmask 191616  }
  0xb7   : > { %1676 = vmatpush3.bf16.msra.mxu0 %v1867_v1  ;;  %s2148_s1 = smov 104   ;;  %s2149_s27 = smov 120   ;;  %v913_v1 = vld [vmem:[%s2485_s26] sm:$0xf]  ;;  %vm1128_vm7 = vcmask 257216   ;;  %vm1328_vm8 = vcmask 523264  }
  0xb8   : > { %s1604_s23 = sshll.u32 %s2504_s25, 3  ;;  %1677 = vmatprep.subr.bf16.mxu0 %v2146_v0  ;;  %s1640_s29 = sshll.u32 %s2504_s25, 4  ;;  %v590_v11 = vsub.s32 0, %v2530_v10 }
  0xb9   : > { %s565_s16 = scalar_lea.vmem %s2699_s0, %s1604_s23  ;;  %s2525_s5 = scalar_lea.vmem %s2702_s3, %s1640_s29 }
  0xba   : > { %v2513_v3 = vld [vmem:[%s565_s16] sm:$0xff]  ;;  %s2150_s24 = smov 112   ;;  %v675_v26 = vld [vmem:[%s2525_s5 + $0x8] sm:$0xf]  ;;  %v676_v29 = vld [vmem:[%s2525_s5 + $0xc] sm:$0xf] }
  0xbb   : > { %v582_v5 = vadd.f32 %v581_v4, %v2513_v3  ;;  %1678 = vmatpush3.bf16.msra.mxu0 %v1868_v2  ;;  %v673_v7 = vld [vmem:[%s2525_s5] sm:$0xf]  ;;  %v674_v20 = vld [vmem:[%s2525_s5 + $0x4] sm:$0xf]  ;;  %v777_v27 = vsel %vm683_vm2, %v675_v26, 0  ;;  %v823_v30 = vsel %vm683_vm2, %v676_v29, 0 }
  0xbc   : > { %1707 = vmatprep.subr.bf16.mxu0 %v2146_v0  ;;  %v685_v8 = vsel %vm683_vm2, %v673_v7, 0  ;;  %v2536_v12 = vld [vmem:[%s2748_s2] sm:$0x7f]  ;;  %v731_v21 = vsel %vm683_vm2, %v674_v20, 0  ;;  %s1605_s23 = sshll.u32 %s2504_s25, 2  ;;  %s2749_s16 = sld [smem:[#allocation22_spill]] }
  0xbd   : > { %v583_v6 = vpack.c.bf16 %v582_v5, %v582_v5  ;;  %1684 = vmatpush3.bf16.msra.mxu1 %v685_v8  ;;  %v591_v13 = vrot.slane %v2536_v12, %v590_v11  ;;  %v921_v2 = vsel %vm683_vm2, %v913_v1, 0  ;;  %s2152_s25 = smov 16   ;;  %s2153_s10 = smov 24  }
  0xbe   : > { %1689 = vmatprep.subr.bf16.mxu1 %v2146_v0  ;;  %s2750_s14 = sld [smem:[#allocation24_spill]]  ;;  %s2752_s5 = sld [smem:[#allocation27_spill]] }
  0xbf   : > { %1680 = vmatmul.mubr.msk.bf16.vlgmr.msra.gmra.mrb[0].mxu0 %vm604_vm1, %v583_v6  ;;  %s1398_s2 = scalar_lea.sflag [#allocation6], %s2473_s9 }
  0xc0   : > { %1709 = vmatprep.mubr.msk.bf16.mxu0 %vm2147_vm0, %v2146_v0  ;;  %1708 = vmatpush3.bf16.msra.mxu0 %v921_v2 }
  0xc1   : > { %1719 = vmatprep.subr.bf16.mxu0 %v2146_v0 }
  0xc2   : > { %s572_s29 = scalar_lea.vmem %s2749_s16, %s1605_s23  ;;  %s2751_s16 = sld [smem:[#allocation26_spill]] }
  0xc3   : > { %v677_v33 = vld [vmem:[%s572_s29] sm:$0xf]  ;;  %s1636_s29 = sshll.u32 %s2129_s20, 7  ;;  %s2154_s20 = smov [#allocation13]  }
  0xc4   : > { %v678_v34 = vunpack.c.l.bf16 %v677_v33  ;;  %s2649_s13 = scalar_lea.hbm %s2752_s5, %s1636_s29 }
 0x192   : > { %v642_v14 = vpop.f32.mrb[0].mxu0 }
 0x193   : > { %v643_v15 = vadd.f32 %v642_v14, %v591_v13  ;;  %v1681_v16 = vpop.f32.mrb[1].mxu0 }
 0x194   : > { %v645_v17 = vpop.f32.mrb[2].mxu0 }
 0x195   : > { %v648_v18 = vpack.c.bf16 %v643_v15, %v643_v15  ;;  %v1682_v19 = vpop.f32.mrb[3].mxu0 }
 0x197   : > { %650 = vst.msk [vmem:[#allocation2] sm:$0xf] %vm649_vm3, %v648_v18  ;;  %664 = vrot.lane.b32.xlu1 %v648_v18, %s2148_s1  ;;  %654 = vrot.lane.b32.xlu0 %v648_v18, %s2149_s27 }
 0x19b   : > { %659 = vrot.lane.b32.xlu0 %v648_v18, %s2150_s24 }
 0x19e   : > { %v669_v22 = vld [vmem:[#allocation2] sm:$0xf] }
 0x19f   : > { %1686 = vmatmul.mubr.msk.bf16.vlgmr.msra.gmra.mrb[0].mxu1 %vm679_vm4, %v669_v22 }
 0x1a0   : > { %1690 = vmatpush3.bf16.msra.mxu1 %v731_v21  ;;  %1691 = vmatprep.mubr.msk.bf16.mxu1 %vm2147_vm0, %v2146_v0  ;;  %v914_v21 = vld [vmem:[%s2485_s26 + $0x4] sm:$0xf] }
 0x1a1   : > { %1695 = vmatprep.subr.bf16.mxu1 %v2146_v0  ;;  %v967_v22 = vsel %vm683_vm2, %v914_v21, 0 }
 0x209   : > { %v665_v23 = vpop.permute.xlu1 %664  ;;  %v655_v24 = vpop.permute.xlu0 %654 }
 0x20a   : > { %668 = vst.msk [vmem:[#allocation2 + $0xc] sm:$0xf] %vm649_vm3, %v665_v23  ;;  %658 = vst.msk [vmem:[#allocation2 + $0x4] sm:$0xf] %vm649_vm3, %v655_v24 }
 0x20d   : > { %v660_v25 = vpop.permute.xlu0 %659 }
 0x20e   : > { %663 = vst.msk [vmem:[#allocation2 + $0x8] sm:$0xf] %vm649_vm3, %v660_v25  ;;  %v915_v25 = vld [vmem:[%s2485_s26 + $0x8] sm:$0xf] }
 0x211   : > { %v670_v28 = vld [vmem:[#allocation2 + $0x4] sm:$0xf]  ;;  %v672_v32 = vld [vmem:[#allocation2 + $0xc] sm:$0xf] }
 0x212   : > { %1692 = vmatmul.mubr.msk.bf16.vlgmr.msra.gmra.mrb[4].mxu1 %vm679_vm4, %v670_v28  ;;  %v1013_v28 = vsel %vm683_vm2, %v915_v25, 0 }
 0x213   : > { %1696 = vmatpush3.bf16.msra.mxu1 %v777_v27  ;;  %1697 = vmatprep.mubr.msk.bf16.mxu1 %vm2147_vm0, %v2146_v0 }
 0x214   : > { %1701 = vmatprep.subr.bf16.mxu1 %v2146_v0 }
 0x215   : > { %v671_v31 = vld [vmem:[#allocation2 + $0x8] sm:$0xf] }
 0x21a   : > { %1698 = vmatmul.mubr.msk.bf16.vlgmr.msra.gmra.mrb[8].mxu1 %vm679_vm4, %v671_v31 }
 0x21b   : > { %1702 = vmatpush3.bf16.msra.mxu1 %v823_v30  ;;  %1703 = vmatprep.mubr.msk.bf16.mxu1 %vm2147_vm0, %v2146_v0 }
 0x21c   : > { %1713 = vmatprep.subr.bf16.mxu1 %v2146_v0 }
 0x222   : > { %1704 = vmatmul.mubr.msk.bf16.vlgmr.msra.gmra.mrb[12].mxu1 %vm679_vm4, %v672_v32  ;;  %v916_v32 = vld [vmem:[%s2485_s26 + $0xc] sm:$0xf]  ;;  %s2151_s26 = smov 8  }
 0x223   : > { %1715 = vmatprep.mubr.msk.bf16.mxu1 %vm2147_vm0, %v2146_v0  ;;  %1714 = vmatpush3.bf16.msra.mxu1 %v967_v22 }
 0x224   : > { %1725 = vmatprep.subr.bf16.mxu1 %v2146_v0 }
 0x272   : > { %v721_v35 = vpop.f32.mrb[0].mxu1 }
 0x273   : > { %v722_v36 = vadd.f32 %v721_v35, %v678_v34  ;;  %v1687_v37 = vpop.f32.mrb[1].mxu1  ;;  %v1059_v35 = vsel %vm683_vm2, %v916_v32, 0 }
 0x274   : > { %v724_v38 = vpop.f32.mrb[2].mxu1 }
 0x275   : > { %v1688_v39 = vpop.f32.mrb[3].mxu1  ;;  %v865_v40 = vsel %vm679_vm4, %v722_v36, -inf }
 0x276   : > { %866 = vmax.xlane.f32.xlu1 %v865_v40 }
 0x2e5   : > { %v767_v41 = vpop.f32.mrb[4].mxu1 }
 0x2e6   : > { %v768_v42 = vadd.f32 %v767_v41, %v678_v34  ;;  %v1693_v43 = vpop.f32.mrb[5].mxu1 }
 0x2e7   : > { %v770_v44 = vpop.f32.mrb[6].mxu1 }
 0x2e8   : > { %v1694_v45 = vpop.f32.mrb[7].mxu1  ;;  %v868_v46 = vsel %vm679_vm4, %v768_v42, -inf }
 0x2e9   : > { %869 = vmax.xlane.f32.xlu0 %v868_v46 }
 0x2ed   : > { %v813_v47 = vpop.f32.mrb[8].mxu1 }
 0x2ee   : > { %v814_v48 = vadd.f32 %v813_v47, %v678_v34  ;;  %v1699_v49 = vpop.f32.mrb[9].mxu1 }
 0x2ef   : > { %v816_v50 = vpop.f32.mrb[10].mxu1 }
 0x2f0   : > { %v1700_v51 = vpop.f32.mrb[11].mxu1  ;;  %v871_v52 = vsel %vm679_vm4, %v814_v48, -inf }
 0x2f1   : > { %872 = vmax.xlane.f32.xlu0 %v871_v52 }
 0x2f5   : > { %v859_v53 = vpop.f32.mrb[12].mxu1 }
 0x2f6   : > { %v860_v54 = vadd.f32 %v859_v53, %v678_v34  ;;  %v1705_v55 = vpop.f32.mrb[13].mxu1  ;;  %v1869_v53 = vld [vmem:[#allocation10] sm:$0xff]  }
 0x2f7   : > { %v862_v56 = vpop.f32.mrb[14].mxu1 }
 0x2f8   : > { %v1706_v57 = vpop.f32.mrb[15].mxu1  ;;  %v874_v58 = vsel %vm679_vm4, %v860_v54, -inf }
 0x2f9   : > { %875 = vmax.xlane.f32.xlu1 %v874_v58 }
 0x303   : > { %v867_v59 = vpop.xlane.xlu1 %866 }
 0x304   : > { %v877_v60 = vsub.f32 %v722_v36, %v867_v59 }
 0x306   : > { %v881_v61 = vmul.f32 1.442695, %v877_v60 }
 0x308   : > { %1877 = vpow2.f32 %v881_v61 }
 0x312   : > { %v1878_v62 = vpop.eup %1877 }
 0x313   : > { %v889_v63 = vsel %vm679_vm4, %v1878_v62, 0.0 }
 0x314   : > { %890 = vadd.xlane.f32.xlu0 %v889_v63 }
 0x376   : > { %v870_v4 = vpop.xlane.xlu0 %869 }
 0x377   : > { %v878_v5 = vsub.f32 %v768_v42, %v870_v4 }
 0x379   : > { %v883_v6 = vmul.f32 1.442695, %v878_v5 }
 0x37b   : > { %1879 = vpow2.f32 %v883_v6 }
 0x37e   : > { %v873_v7 = vpop.xlane.xlu0 %872 }
 0x37f   : > { %v879_v8 = vsub.f32 %v814_v48, %v873_v7  ;;  %v1137_v7 = vsub.s32 1, %v2530_v10 }
 0x381   : > { %v885_v9 = vmul.f32 1.442695, %v879_v8  ;;  %v1138_v8 = vrot.slane %v2536_v12, %v1137_v7  ;;  %v1393_v7 = vsub.s32 5, %v2530_v10 }
 0x383   : > { %1881 = vpow2.f32 %v885_v9 }
 0x385   : > { %v1880_v11 = vpop.eup %1879 }
 0x386   : > { %v876_v13 = vpop.xlane.xlu1 %875  ;;  %v892_v14 = vsel %vm679_vm4, %v1880_v11, 0.0 }
 0x387   : > { %v880_v15 = vsub.f32 %v860_v54, %v876_v13  ;;  %893 = vadd.xlane.f32.xlu1 %v892_v14  ;;  %v1870_v54 = vld [vmem:[#allocation10 + $0x8] sm:$0xff]  }
 0x389   : > { %v887_v16 = vmul.f32 1.442695, %v880_v15 }
 0x38b   : > { %1883 = vpow2.f32 %v887_v16 }
 0x38d   : > { %v1882_v17 = vpop.eup %1881 }
 0x38e   : > { %v895_v18 = vsel %vm679_vm4, %v1882_v17, 0.0 }
 0x38f   : > { %896 = vadd.xlane.f32.xlu0 %v895_v18 }
 0x395   : > { %v1884_v19 = vpop.eup %1883 }
 0x396   : > { %v898_v20 = vsel %vm679_vm4, %v1884_v19, 0.0 }
 0x397   : > { %899 = vadd.xlane.f32.xlu1 %v898_v20 }
 0x3a1   : > { %v891_v23 = vpop.xlane.xlu0 %890 }
 0x3a2   : > { %1885 = vrcp.f32 %v891_v23  ;;  %v1871_v23 = vld [vmem:[#allocation12] sm:$0xff]  }
 0x3ac   : > { %v1886_v24 = vpop.eup %1885 }
 0x3ad   : > { %v905_v26 = vmul.f32 %v1886_v24, %v1878_v62  ;;  %v1872_v24 = vld [vmem:[#allocation12 + $0x8] sm:$0xff]  }
 0x3af   : > { %v909_v27 = vpack.c.bf16 %v905_v26, %v905_v26 }
 0x3b1   : > { %1710 = vmatmul.mubr.msk.bf16.vlgmr.msra.gmra.mrb[4].mxu0 %vm679_vm4, %v909_v27 }
 0x3b2   : > { %1720 = vmatpush3.bf16.msra.mxu0 %v1013_v28  ;;  %1721 = vmatprep.mubr.msk.bf16.mxu0 %vm2147_vm0, %v2146_v0  ;;  %v1216_v28 = vsub.s32 3, %v2530_v10 }
 0x3b3   : > { %1731 = vmatprep.subr.bf16.mxu0 %v2146_v0 }
 0x3b4   : > { %v1217_v32 = vrot.slane %v2536_v12, %v1216_v28 }
 0x414   : > { %v894_v29 = vpop.xlane.xlu1 %893 }
 0x415   : > { %1887 = vrcp.f32 %v894_v29 }
 0x41c   : > { %v897_v30 = vpop.xlane.xlu0 %896 }
 0x41d   : > { %1889 = vrcp.f32 %v897_v30 }
 0x41f   : > { %v1888_v31 = vpop.eup %1887 }
 0x420   : > { %v906_v33 = vmul.f32 %v1888_v31, %v1880_v11 }
 0x422   : > { %v910_v34 = vpack.c.bf16 %v906_v33, %v906_v33 }
 0x424   : > { %1716 = vmatmul.mubr.msk.bf16.vlgmr.msra.gmra.mrb[16].mxu1 %vm679_vm4, %v910_v34  ;;  %v900_v36 = vpop.xlane.xlu1 %899 }
 0x425   : > { %1891 = vrcp.f32 %v900_v36  ;;  %1726 = vmatpush3.bf16.msra.mxu1 %v1059_v35  ;;  %1727 = vmatprep.mubr.msk.bf16.mxu1 %vm2147_vm0, %v2146_v0  ;;  %v1873_v36 = vld [vmem:[%s2750_s14] sm:$0xff]  }
 0x426   : > { %1739 = vmatprep.subr.bf16.mxu1 %v2146_v0 }
 0x427   : > { %v1890_v37 = vpop.eup %1889 }
 0x428   : > { %v907_v38 = vmul.f32 %v1890_v37, %v1882_v17  ;;  %v1874_v37 = vld [vmem:[%s2750_s14 + $0x8] sm:$0xff]  }
 0x42a   : > { %v911_v39 = vpack.c.bf16 %v907_v38, %v907_v38  ;;  %v1875_v38 = vld [vmem:[%s2750_s14 + $0x10] sm:$0xff]  }
 0x42c   : > { %1722 = vmatmul.mubr.msk.bf16.vlgmr.msra.gmra.mrb[8].mxu0 %vm679_vm4, %v911_v39  ;;  %v1876_v39 = vld [vmem:[%s2750_s14 + $0x18] sm:$0xff]  }
 0x42d   : > { %1735 = vmatprep.mubr.msk.bf16.mxu0 %vm2147_vm0, %v2146_v0  ;;  %1732 = vmatpush3.bf16.msra.mxu0 %v1869_v53 }
 0x42e   : > { %1733 = vmatprep.subr.bf16.mxu0 %v2146_v0 }
 0x42f   : > { %v1892_v40 = vpop.eup %1891 }
 0x430   : > { %v908_v41 = vmul.f32 %v1892_v40, %v1884_v19  ;;  %v1626_v40 = vld [vmem:[%s2751_s16] ss:$0 sm:$0xff] }
 0x431   : > { %1734 = vmatpush3.bf16.msra.mxu0 %v1870_v54 }
 0x432   : > { %v912_v42 = vpack.c.bf16 %v908_v41, %v908_v41  ;;  %1747 = vmatprep.subr.bf16.mxu0 %v2146_v0 }
 0x434   : > { %1728 = vmatmul.mubr.msk.bf16.vlgmr.msra.gmra.mrb[20].mxu1 %vm679_vm4, %v912_v42 }
 0x435   : > { %1743 = vmatprep.mubr.msk.bf16.mxu1 %vm2147_vm0, %v2146_v0  ;;  %1740 = vmatpush3.bf16.msra.mxu1 %v1871_v23 }
 0x436   : > { %1741 = vmatprep.subr.bf16.mxu1 %v2146_v0 }
 0x439   : > { %1742 = vmatpush3.bf16.msra.mxu1 %v1872_v24 }
 0x484   : > { %v957_v43 = vpop.f32.mrb[4].mxu0 }
 0x485   : > { %v1101_v44 = vpack.c.bf16 %v957_v43, %v957_v43  ;;  %v1711_v45 = vpop.f32.mrb[5].mxu0 }
 0x486   : > { %v960_v46 = vpop.f32.mrb[6].mxu0 }
 0x487   : > { %1102 = vst.msk [vmem:[#allocation3] sm:$0xf] %vm649_vm3, %v1101_v44  ;;  %v1712_v47 = vpop.f32.mrb[7].mxu0 }
 0x4f7   : > { %v1003_v48 = vpop.f32.mrb[16].mxu1 }
 0x4f8   : > { %v1642_v49 = vpack.c.bf16 %v1003_v48, %v1003_v48  ;;  %v1717_v50 = vpop.f32.mrb[17].mxu1 }
 0x4f9   : > { %v1006_v51 = vpop.f32.mrb[18].mxu1 }
 0x4fa   : > { %1107 = vrot.lane.b32.xlu0 %v1642_v49, %s2151_s26  ;;  %v1718_v52 = vpop.f32.mrb[19].mxu1  ;;  %v1302_v51 = vsub.s32 6, %v2530_v10  ;;  %s558_s26 = scalar_lea.vmem [#allocation13], %s1598_s17  ;;  %s2047_s17 = sshll.u32 %s2154_s20, 4  ;;  %s2048_s17 = int_to_ptr.vmem [resolvable:$false] %s2047_s17 }
 0x4fb   : > { %s2049_s27 = scalar_lea.vmem %s2048_s17, 256 }
 0x4fc   : > { %v1303_v52 = vrot.slane %v2536_v12, %v1302_v51 }
 0x4ff   : > { %v1049_v55 = vpop.f32.mrb[8].mxu0 }
 0x500   : > { %v1643_v56 = vpack.c.bf16 %v1049_v55, %v1049_v55  ;;  %v1723_v57 = vpop.f32.mrb[9].mxu0 }
 0x501   : > { %v1052_v58 = vpop.f32.mrb[10].mxu0 }
 0x502   : > { %v1724_v59 = vpop.f32.mrb[11].mxu0  ;;  %1116 = vrot.lane.b32.xlu1 %v1643_v56, %s2152_s25  ;;  %s1412_s25 = sshll.u32 %s558_s26, 4  ;;  %s2651_s25 = int_to_ptr.vmem [resolvable:$true] %s1412_s25 }
 0x503   : > { %s2043_s1 = scalar_lea.vmem %s2651_s25, 128  ;;  %p2050_p3 = scmp.lt.s32.totalorder %s2651_s25, %s2048_s17 }
 0x504   : > { %p2044_p8 = scmp.ne.s32.totalorder %s2651_s25, %s2043_s1  ;;  %p2051_p5 = scmp.lt.s32.totalorder %s2049_s27, %s2043_s1 }
 0x506   : > { %p2045_p1 = pnand %p2044_p8, %p2371_p10  ;;  %p2052_p11 = por %p2051_p5, %p2050_p3 }
 0x507   : > { %v1095_v60 = vpop.f32.mrb[20].mxu1 }
 0x508   : > { %v1644_v61 = vpack.c.bf16 %v1095_v60, %v1095_v60  ;;  %v1729_v62 = vpop.f32.mrb[21].mxu1  ;;  %p2046_p13 = pneg %p2045_p1 }
 0x509   : > { %v1098_v63 = vpop.f32.mrb[22].mxu1 }
 0x50a   : > { %1125 = vrot.lane.b32.xlu1 %v1644_v61, %s2153_s10  ;;  %v1730_v1 = vpop.f32.mrb[23].mxu1  ;;  %p2053_p12 = pnand %p2052_p11, %p2046_p13 }
 0x56c   : > { %v1108_v2 = vpop.permute.xlu0 %1107 }
 0x56d   : > { %1111 = vst.msk [vmem:[#allocation3] sm:$0xf] %vm1110_vm5, %v1108_v2 }
 0x574   : > { %v1117_v4 = vpop.permute.xlu1 %1116 }
 0x575   : > { %1120 = vst.msk [vmem:[#allocation3] sm:$0xf] %vm1119_vm6, %v1117_v4 }
 0x57c   : > { %v1126_v5 = vpop.permute.xlu1 %1125 }
 0x57d   : > { %1129 = vst.msk [vmem:[#allocation3] sm:$0xf] %vm1128_vm7, %v1126_v5 }
 0x584   : > { %v1130_v6 = vld [vmem:[#allocation3] sm:$0xf] }
 0x585   : > { %1736 = vmatmul.mubr.msk.bf16.vlgmr.msra.gmra.mrb[12].mxu0 %vm604_vm1, %v1130_v6  ;;  %v1388_v6 = vsub.s32 4, %v2530_v10 }
 0x586   : > { %1755 = vmatprep.mubr.msk.bf16.mxu0 %vm2147_vm0, %v2146_v0  ;;  %1748 = vmatpush3.bf16.msra.mxu0 %v1873_v36 }
 0x587   : > { %1749 = vmatprep.subr.bf16.mxu0 %v2146_v0 }
 0x58a   : > { %1750 = vmatpush3.bf16.msra.mxu0 %v1874_v37 }
 0x58b   : > { %1751 = vmatprep.subr.bf16.mxu0 %v2146_v0 }
 0x58e   : > { %1752 = vmatpush3.bf16.msra.mxu0 %v1875_v38 }
 0x58f   : > { %1753 = vmatprep.subr.bf16.mxu0 %v2146_v0 }
 0x592   : > { %1754 = vmatpush3.bf16.msra.mxu0 %v1876_v39 }
 0x658   : > { %v1188_v9 = vpop.f32.mrb[12].mxu0 }
 0x659   : > { %v1189_v11 = vadd.f32 %v1188_v9, %v1138_v8  ;;  %v1737_v13 = vpop.f32.mrb[13].mxu0  ;;  %v1389_v8 = vrot.slane %v2536_v12, %v1388_v6 }
 0x65a   : > { %v1191_v14 = vpop.f32.mrb[14].mxu0  ;;  %v1394_v13 = vrot.slane %v2536_v12, %v1393_v7 }
 0x65b   : > { %v1738_v15 = vpop.f32.mrb[15].mxu0  ;;  %v1194_v16 = vadd.f32 %v1189_v11, %v2513_v3  ;;  %v1211_v3 = vsub.s32 2, %v2530_v10 }
 0x65d   : > { %v1195_v17 = vsel %vm604_vm1, %v1194_v16, 0.0  ;;  %v1212_v29 = vrot.slane %v2536_v12, %v1211_v3 }
 0x65e   : > { %1196 = vadd.xlane.f32.xlu0 %v1195_v17 }
 0x6eb   : > { %v1197_v18 = vpop.xlane.xlu0 %1196 }
 0x6ec   : > { %v1199_v19 = vmul.f32 0.03125, %v1197_v18 }
 0x6ee   : > { %v1200_v20 = vsub.f32 %v1194_v16, %v1199_v19 }
 0x6f0   : > { %v1201_v21 = vmul.f32 %v1200_v20, %v1200_v20 }
 0x6f2   : > { %v1202_v22 = vsel %vm604_vm1, %v1201_v21, 0.0 }
 0x6f3   : > { %1203 = vadd.xlane.f32.xlu1 %v1202_v22 }
 0x780   : > { %v1204_v25 = vpop.xlane.xlu1 %1203 }
 0x781   : > { %v1205_v26 = vmul.f32 0.03125, %v1204_v25 }
 0x783   : > { %v1206_v27 = vadd.f32 1e-05, %v1205_v26 }
 0x785   : > { %1893 = vrsqrt.f32 %v1206_v27 }
 0x78f   : > { %v1894_v30 = vpop.eup %1893 }
 0x790   : > { %v1208_v31 = vmul.f32 %v1894_v30, %v1200_v20 }
 0x792   : > { %v1213_v33 = vmul.f32 %v1212_v29, %v1208_v31 }
 0x794   : > { %v1218_v34 = vadd.f32 %v1217_v32, %v1213_v33 }
 0x796   : > { %v1219_v35 = vpack.c.bf16 %v1218_v34, %v1218_v34 }
 0x798   : > { %1744 = vmatmul.mubr.msk.bf16.vlgmr.msra.gmra.mrb[24].mxu1 %vm604_vm1, %v1219_v35 }
 0x86b   : > { %v1280_v41 = vpop.f32.mrb[24].mxu1 }
 0x86c   : > { %v1281_v42 = vadd.f32 %v1626_v40, %v1280_v41  ;;  %v1745_v43 = vpop.f32.mrb[25].mxu1 }
 0x86d   : > { %v1283_v44 = vpop.f32.mrb[26].mxu1 }
 0x86e   : > { %v1287_v45 = vmul.f32 0.70710677, %v1281_v42  ;;  %v1746_v46 = vpop.f32.mrb[27].mxu1  ;;  %v1286_v48 = vmul.f32 0.5, %v1281_v42 }
 0x870   : > { %1895 = verf.f32 %v1287_v45 }
 0x87a   : > { %v1896_v47 = vpop.eup %1895 }
 0x87b   : > { %v1289_v49 = vadd.f32 1.0, %v1896_v47 }
 0x87d   : > { %v1290_v0 = vmul.f32 %v1289_v49, %v1286_v48 }
 0x87f   : > { %v1291_v50 = vpack.c.bf16 %v1290_v0, %v1290_v0 }
 0x881   : > { %1756 = vmatmul.mubr.msk.bf16.vlgmr.msra.gmra.mrb[16].mxu0 %vm1328_vm8, %v1291_v50 }
 0x954   : > { %v1366_v53 = vpop.f32.mrb[16].mxu0 }
 0x955   : > { %v1367_v54 = vadd.f32 %v1366_v53, %v1303_v52  ;;  %v1757_v55 = vpop.f32.mrb[17].mxu0 }
 0x956   : > { %v1369_v56 = vpop.f32.mrb[18].mxu0 }
 0x957   : > { %v1758_v57 = vpop.f32.mrb[19].mxu0  ;;  %v1372_v58 = vadd.f32 %v1367_v54, %v1218_v34 }
 0x959   : > { %v1373_v59 = vsel %vm604_vm1, %v1372_v58, 0.0 }
 0x95a   : > { %1374 = vadd.xlane.f32.xlu0 %v1373_v59 }
 0x9e7   : > { %v1375_v60 = vpop.xlane.xlu0 %1374 }
 0x9e8   : > { %v1376_v61 = vmul.f32 0.03125, %v1375_v60 }
 0x9ea   : > { %v1377_v62 = vsub.f32 %v1372_v58, %v1376_v61 }
 0x9ec   : > { %v1378_v63 = vmul.f32 %v1377_v62, %v1377_v62 }
 0x9ee   : > { %v1379_v1 = vsel %vm604_vm1, %v1378_v63, 0.0 }
 0x9ef   : > { %1380 = vadd.xlane.f32.xlu0 %v1379_v1 }
 0xa7c   : > { %v1381_v2 = vpop.xlane.xlu0 %1380 }
 0xa7d   : > { %v1382_v4 = vmul.f32 0.03125, %v1381_v2 }
 0xa7f   : > { %v1383_v5 = vadd.f32 1e-05, %v1382_v4 }
 0xa81   : > { %1897 = vrsqrt.f32 %v1383_v5 }
 0xa8b   : > { %v1898_v9 = vpop.eup %1897 }
 0xa8c   : > { %v1385_v11 = vmul.f32 %v1898_v9, %v1377_v62 }
 0xa8e   : > { %v1390_v14 = vmul.f32 %v1389_v8, %v1385_v11 }
 0xa90   : > { %v1395_v15 = vadd.f32 %v1394_v13, %v1390_v14 }
 0xa92   : > { %1396 = vst.msk [vmem:[%s558_s26] sm:$0xff] %vm604_vm1, %v1395_v15 }
 0xa93   : > { %2056 = shalt.err (!%p2053_p12)
}
 0xa94   : > { %s2057_s9 = scalar_lea.hbm %s2649_s13, 128  ;;  %s2061_s11 = scalar_lea.hbm %s2752_s5, 256 }
 0xa95   : > { %p2058_p6 = scmp.ne.s32.totalorder %s2649_s13, %s2057_s9  ;;  %p2062_p0 = scmp.lt.u32.totalorder %s2649_s13, %s2752_s5 }
 0xa96   : > { %p2063_p2 = scmp.lt.u32.totalorder %s2061_s11, %s2057_s9  ;;  %p2065_p8 = scmp.lt.u32.totalorder %s2057_s9, %s2649_s13 }
 0xa97   : > { %p2059_p7 = pnand %p2058_p6, %p2371_p10 }
 0xa98   : > { %p2064_p4 = por %p2063_p2, %p2062_p0 }
 0xa99   : > { %p2060_p9 = pneg %p2059_p7 }
 0xa9a   : > { %p2066_p1 = por %p2065_p8, %p2064_p4 }
 0xa9c   : > { %p2067_p13 = pnand %p2066_p1, %p2060_p9 }
 0xa9e   : > { %2070 = shalt.err (!%p2067_p13)
}
 0xa9f   : > { %1775 = dma.vmem_to_hbm [thread:$0]  (%p2371_p10), %s2651_s25, 128, %s2649_s13, %s1398_s2  }
 0xaa0 PF: > { %s2753_s29 = sld [smem:[#allocation19_spill]]  ;;  %s2754_s26 = sld [smem:[#allocation20_spill]] }
 0xaa1   : > { %p2756_p5 = scmp.ge.s32.totalorder %s2137_s22, 2 }
 0xaa6   : > { %s1424_s10 = sand.u32 1, %s2753_s29   ;;  %p2755_p3 = scmp.ne.s32.totalorder %s2754_s26, 0 }
 0xaa7   : > { %s1425_s15 = scalar_lea.sflag [#allocation6], %s1424_s10 }
 0xaa8   : > { %p1795_p11 = pnand %p2756_p5, %p2755_p3 }
 0xaaa   : > { %2112 = dma.done.wait (!%p1795_p11), %s1425_s15, 128  }
 0xaab   : > { %2114 = vsyncadd (!%p1795_p11), %s1425_s15, 4294967168  ;;  %s31_s22 = sadd.s32 1, %s2137_s22   ;;  %s2757_s17 = smov %s2121_s18 }
 0xaac   : > { %p28_p12 = scmp.ge.s32.totalorder %s31_s22, 4   ;;  %s2758_s18 = smov %s2125_s19 }
 0xaad   : > { %s2759_s19 = smov %s2386_s28  ;;  %s2760_s20 = smov %s2133_s21 }
 0xaae   : > { %s2761_s21 = smov %s2763_s30  ;;  %30 = sbr.rel (!%p28_p12) target bundleno = 17 (0x11), region = 146 }
 0xab5   :  { %1430 = vsyncpa [#allocation5], 1 }
 0xab6   :  { %1432 = vsyncpa [#allocation5 + $0x1], 1 }
 0xab7   :  { %1433 = vsyncpa [#allocation8], 1 }
 0xab8   :  { %1435 = vsyncpa [#allocation8 + $0x1], 1 }
 0xab9   :  { %1436 = vsyncpa [#allocation11], 1 }
 0xaba   :  { %1437 = vsyncpa [#allocation6], 1 }
 0xabb   :  { %1439 = vsyncpa [#allocation6 + $0x1], 1 }

</bundles_post_ra>
